<compile_context>
chip_gen: v6e
topology: v6e:2x2x1
jax: 0.10.0
libtpu: 0.0.40
codegen_flags: <defaults>
</compile_context>

<pallas_src>
import functools

import jax
import jax.numpy as jnp
from jax import lax
from jax.experimental import pallas as pl
from jax.experimental.pallas import tpu as pltpu


def _sa_kernel(H, W, K, bblk, base, x_ref, wsa_ref, o_ref, amp_ref):
    HW = H * W
    pad = (K - 1) // 2
    KK = K * K

    # ---- channel statistics for the whole batch block ----------------------
    x = x_ref[...]                                   # (bblk, C, HW) lane-dense
    s = jnp.sum(x, axis=1)                           # (bblk, HW)  (1/C folded into weights)
    m = jnp.max(x, axis=1)                           # (bblk, HW)

    # zero-haloed stats slab, sublane layout: [sum_0..sum_{b-1}, max_0..max_{b-1}]
    amp_ref[...] = jnp.zeros_like(amp_ref)           # halo must be zero every step
    amp_ref[0:bblk, base:base + HW] = s              # lane-aligned center stores
    amp_ref[bblk:2 * bblk, base:base + HW] = m

    # ---- hoisted constants --------------------------------------------------
    # all 2*K*K tap weights as SMEM scalars (avg weights pre-scaled by 1/C on host)
    wts = [[(wsa_ref[kh * K + kw], wsa_ref[KK + kh * K + kw])
            for kw in range(K)] for kh in range(K)]
    # per-sublane selector: first bblk rows are the sum-stat, last bblk the max-stat
    is_sum = lax.broadcasted_iota(jnp.int32, (2 * bblk, 1), 0) < bblk
    # lane -> image-column index, for column-wrap masking (computed in-kernel)
    lane = lax.broadcasted_iota(jnp.int32, (1, HW), 1)
    col = (lane & (W - 1)) if (W & (W - 1)) == 0 else (lane % W)

    # ---- K x K "same" conv on the flattened map -----------------------------
    conv = jnp.zeros((2 * bblk, HW), jnp.float32)
    for kw in range(K):
        acc = jnp.zeros((2 * bblk, HW), jnp.float32)
        for kh in range(K):
            start = base + (kh - pad) * W + (kw - pad)        # static lane offset
            win = amp_ref[:, start:start + HW]                # ONE fused (2*bblk, HW) window
            w_sum, w_max = wts[kh][kw]
            wcol = jnp.where(is_sum, w_sum, w_max)            # (2*bblk, 1) weight column
            acc = acc + wcol * win
        # kill column-wrapped lanes once per kw (row overrun hits the zero halo)
        valid = jnp.logical_and(col >= (pad - kw), col < (W + pad - kw))
        conv = conv + acc * valid.astype(jnp.float32)

    # fold sum-rows + max-rows -> per-image conv result, then sigmoid on the EUP
    res = conv[0:bblk, :] + conv[bblk:2 * bblk, :]            # (bblk, HW)
    sig = pl.reciprocal(1.0 + jnp.exp(-res), approx=False)
    o_ref[:, 0, :] = sig


def _pick_bblk(B, max_bblk=4):
    """Largest divisor of B <= max_bblk, preferring >= 2 grid steps (v7x has 2 TCs)."""
    divs = [d for d in range(min(max_bblk, B), 0, -1) if B % d == 0]
    for d in divs:
        if B // d >= 2:
            return d
    return divs[0]


def spatial_attention_pallas(x, wsa, *, max_bblk=4):
    """x: (B, C, H, W) f32.  wsa: (1, 2, K, K) = conv1.weight (bias-free)."""
    B, C, H, W = x.shape
    K = wsa.shape[-1]
    pad = (K - 1) // 2
    HW = H * W

    # robustness: the lane-dense layout / aligned stores / in-bounds tap slices
    # silently depend on these (VMEM refs have no runtime bounds check).
    assert HW % 128 == 0, "H*W must be a multiple of 128 for the lane-dense layout"
    halo = pad * W + pad                         # max |tap offset| in flattened lanes
    base = ((halo + 127) // 128) * 128           # lane-aligned center offset
    assert base % 128 == 0 and base >= halo
    assert base + HW + halo <= HW + 2 * base     # all tap windows stay in-bounds

    bblk = _pick_bblk(B, max_bblk)
    grid = (B // bblk,)

    xf = x.reshape(B, C, HW)                     # lane-dense view (free reshape)
    # flat tap weights to SMEM; fold the channel-mean 1/C into the avg weights
    w = wsa.reshape(2, K * K)
    wflat = jnp.concatenate([w[0] / C, w[1]]).astype(jnp.float32)   # (2*K*K,)

    cost = pl.CostEstimate(
        flops=B * HW * (2 * C + 6 * K * K + 2 * K + 4),
        transcendentals=2 * B * HW,
        bytes_accessed=4 * (B * C * HW + B * HW + 2 * K * K),
    )

    sa = pl.pallas_call(
        functools.partial(_sa_kernel, H, W, K, bblk, base),
        out_shape=jax.ShapeDtypeStruct((B, 1, HW), jnp.float32),
        grid_spec=pltpu.PrefetchScalarGridSpec(
            num_scalar_prefetch=0,
            grid=grid,
            in_specs=[pl.BlockSpec((bblk, C, HW), lambda b: (b, 0, 0)),
                      pl.BlockSpec(memory_space=pltpu.MemorySpace.SMEM)],
            out_specs=pl.BlockSpec((bblk, 1, HW), lambda b: (b, 0, 0)),
            scratch_shapes=[pltpu.VMEM((2 * bblk, HW + 2 * base), jnp.float32)]),
        compiler_params=pltpu.CompilerParams(
            dimension_semantics=("parallel",),
            vmem_limit_bytes=32 * 1024 * 1024),
        cost_estimate=cost,
    )(xf, wflat)
    return sa.reshape(B, 1, H, W)


# ------------------- pure-JAX reference (for correctness check) -------------------
def spatial_attention_ref(x, wsa):
    B, C, H, W = x.shape
    K = wsa.shape[-1]
    pad = (K - 1) // 2
    avg = x.mean(axis=1, keepdims=True)
    mx = x.max(axis=1, keepdims=True)
    am = jnp.concatenate([avg, mx], axis=1)                       # (B, 2, H, W)
    amp = jnp.pad(am, ((0, 0), (0, 0), (pad, pad), (pad, pad)))
    w = wsa.reshape(2, K, K)
    conv = jnp.zeros((B, H, W), x.dtype)
    for c in range(2):
        for kh in range(K):
            for kw in range(K):
                conv = conv + w[c, kh, kw] * amp[:, c, kh:kh + H, kw:kw + W]
    return (1.0 / (1.0 + jnp.exp(-conv)))[:, None, :, :]


if __name__ == "__main__":
    B, C, H, W, K = 8, 16, 16, 16, 7    # bblk=4 -> grid=(2,): batch-packed, 2 steps

    key = jax.random.PRNGKey(0)
    kx, kw = jax.random.split(key)
    x = jax.random.normal(kx, (B, C, H, W), jnp.float32)
    # Conv2d(2, 1, kernel_size=7, padding=3, bias=False).weight
    wsa = jax.random.normal(kw, (1, 2, K, K), jnp.float32) * 0.1

    res = jax.block_until_ready(spatial_attention_pallas(x, wsa))
    ref = spatial_attention_ref(x, wsa)

    assert res.shape == ref.shape == (B, 1, H, W)
    if not bool(jnp.allclose(res, ref, atol=1e-4, rtol=1e-4)):
        raise AssertionError("Pallas SpatialAttention result does not match reference")
    print("KERNEL_OK")
</pallas_src>

<mosaic_0001>
module attributes {stable_mosaic.version = 11 : i64} {
  func.func @_sa_kernel(%arg0: i32, %arg1: memref<4x16x256xf32, #tpu.memory_space<vmem>>, %arg2: memref<98xf32, #tpu.memory_space<smem>>, %arg3: memref<4x1x256xf32, #tpu.memory_space<vmem>>, %arg4: memref<8x512xf32, #tpu.memory_space<vmem>>) attributes {dimension_semantics = [#tpu.dimension_semantics<parallel>], iteration_bounds = array<i64: 2>, scalar_prefetch = 0 : i64, scratch_operands = 1 : i64, tpu.core_type = #tpu.core_type<tc>, window_params = [{transform_indices = @transform_0, window_bounds = array<i64: 4, 16, 256>}, {transform_indices = @transform_1, window_bounds = array<i64: 98>}, {transform_indices = @transform_2, window_bounds = array<i64: 4, 1, 256>}]} {
    %c0 = arith.constant 0 : index
    %c0_0 = arith.constant 0 : index
    %c0_1 = arith.constant 0 : index
    %0 = vector.load %arg1[%c0, %c0_0, %c0_1] : memref<4x16x256xf32, #tpu.memory_space<vmem>>, vector<4x16x256xf32>
    %cst = arith.constant dense<0.000000e+00> : vector<4x256xf32>
    %1 = vector.multi_reduction <add>, %0, %cst [1] : vector<4x16x256xf32> to vector<4x256xf32>
    %cst_2 = arith.constant dense<0xFF800000> : vector<4x256xf32>
    %2 = vector.multi_reduction <maximumf>, %0, %cst_2 [1] : vector<4x16x256xf32> to vector<4x256xf32>
    %cst_3 = arith.constant 0.000000e+00 : f32
    %3 = vector.broadcast %cst_3 : f32 to vector<8x512xf32>
    %c0_4 = arith.constant 0 : index
    %c0_5 = arith.constant 0 : index
    %4 = vector.load %arg4[%c0_4, %c0_5] : memref<8x512xf32, #tpu.memory_space<vmem>>, vector<8x512xf32>
    tpu.vector_store %arg4[%c0_4, %c0_5], %3 {strides = array<i32>} : memref<8x512xf32, #tpu.memory_space<vmem>>, vector<8x512xf32>,
    %c0_6 = arith.constant 0 : index
    %c128 = arith.constant 128 : index
    %5 = vector.load %arg4[%c0_6, %c128] : memref<8x512xf32, #tpu.memory_space<vmem>>, vector<4x256xf32>
    tpu.vector_store %arg4[%c0_6, %c128], %1 {strides = array<i32>} : memref<8x512xf32, #tpu.memory_space<vmem>>, vector<4x256xf32>,
    %c4 = arith.constant 4 : index
    %c128_7 = arith.constant 128 : index
    %6 = vector.load %arg4[%c4, %c128_7] : memref<8x512xf32, #tpu.memory_space<vmem>>, vector<4x256xf32>
    tpu.vector_store %arg4[%c4, %c128_7], %2 {strides = array<i32>} : memref<8x512xf32, #tpu.memory_space<vmem>>, vector<4x256xf32>,
    %c0_8 = arith.constant 0 : index
    %7 = memref.load %arg2[%c0_8] : memref<98xf32, #tpu.memory_space<smem>>
    %c49 = arith.constant 49 : index
    %8 = memref.load %arg2[%c49] : memref<98xf32, #tpu.memory_space<smem>>
    %c1 = arith.constant 1 : index
    %9 = memref.load %arg2[%c1] : memref<98xf32, #tpu.memory_space<smem>>
    %c50 = arith.constant 50 : index
    %10 = memref.load %arg2[%c50] : memref<98xf32, #tpu.memory_space<smem>>
    %c2 = arith.constant 2 : index
    %11 = memref.load %arg2[%c2] : memref<98xf32, #tpu.memory_space<smem>>
    %c51 = arith.constant 51 : index
    %12 = memref.load %arg2[%c51] : memref<98xf32, #tpu.memory_space<smem>>
    %c3 = arith.constant 3 : index
    %13 = memref.load %arg2[%c3] : memref<98xf32, #tpu.memory_space<smem>>
    %c52 = arith.constant 52 : index
    %14 = memref.load %arg2[%c52] : memref<98xf32, #tpu.memory_space<smem>>
    %c4_9 = arith.constant 4 : index
    %15 = memref.load %arg2[%c4_9] : memref<98xf32, #tpu.memory_space<smem>>
    %c53 = arith.constant 53 : index
    %16 = memref.load %arg2[%c53] : memref<98xf32, #tpu.memory_space<smem>>
    %c5 = arith.constant 5 : index
    %17 = memref.load %arg2[%c5] : memref<98xf32, #tpu.memory_space<smem>>
    %c54 = arith.constant 54 : index
    %18 = memref.load %arg2[%c54] : memref<98xf32, #tpu.memory_space<smem>>
    %c6 = arith.constant 6 : index
    %19 = memref.load %arg2[%c6] : memref<98xf32, #tpu.memory_space<smem>>
    %c55 = arith.constant 55 : index
    %20 = memref.load %arg2[%c55] : memref<98xf32, #tpu.memory_space<smem>>
    %c7 = arith.constant 7 : index
    %21 = memref.load %arg2[%c7] : memref<98xf32, #tpu.memory_space<smem>>
    %c56 = arith.constant 56 : index
    %22 = memref.load %arg2[%c56] : memref<98xf32, #tpu.memory_space<smem>>
    %c8 = arith.constant 8 : index
    %23 = memref.load %arg2[%c8] : memref<98xf32, #tpu.memory_space<smem>>
    %c57 = arith.constant 57 : index
    %24 = memref.load %arg2[%c57] : memref<98xf32, #tpu.memory_space<smem>>
    %c9 = arith.constant 9 : index
    %25 = memref.load %arg2[%c9] : memref<98xf32, #tpu.memory_space<smem>>
    %c58 = arith.constant 58 : index
    %26 = memref.load %arg2[%c58] : memref<98xf32, #tpu.memory_space<smem>>
    %c10 = arith.constant 10 : index
    %27 = memref.load %arg2[%c10] : memref<98xf32, #tpu.memory_space<smem>>
    %c59 = arith.constant 59 : index
    %28 = memref.load %arg2[%c59] : memref<98xf32, #tpu.memory_space<smem>>
    %c11 = arith.constant 11 : index
    %29 = memref.load %arg2[%c11] : memref<98xf32, #tpu.memory_space<smem>>
    %c60 = arith.constant 60 : index
    %30 = memref.load %arg2[%c60] : memref<98xf32, #tpu.memory_space<smem>>
    %c12 = arith.constant 12 : index
    %31 = memref.load %arg2[%c12] : memref<98xf32, #tpu.memory_space<smem>>
    %c61 = arith.constant 61 : index
    %32 = memref.load %arg2[%c61] : memref<98xf32, #tpu.memory_space<smem>>
    %c13 = arith.constant 13 : index
    %33 = memref.load %arg2[%c13] : memref<98xf32, #tpu.memory_space<smem>>
    %c62 = arith.constant 62 : index
    %34 = memref.load %arg2[%c62] : memref<98xf32, #tpu.memory_space<smem>>
    %c14 = arith.constant 14 : index
    %35 = memref.load %arg2[%c14] : memref<98xf32, #tpu.memory_space<smem>>
    %c63 = arith.constant 63 : index
    %36 = memref.load %arg2[%c63] : memref<98xf32, #tpu.memory_space<smem>>
    %c15 = arith.constant 15 : index
    %37 = memref.load %arg2[%c15] : memref<98xf32, #tpu.memory_space<smem>>
    %c64 = arith.constant 64 : index
    %38 = memref.load %arg2[%c64] : memref<98xf32, #tpu.memory_space<smem>>
    %c16 = arith.constant 16 : index
    %39 = memref.load %arg2[%c16] : memref<98xf32, #tpu.memory_space<smem>>
    %c65 = arith.constant 65 : index
    %40 = memref.load %arg2[%c65] : memref<98xf32, #tpu.memory_space<smem>>
    %c17 = arith.constant 17 : index
    %41 = memref.load %arg2[%c17] : memref<98xf32, #tpu.memory_space<smem>>
    %c66 = arith.constant 66 : index
    %42 = memref.load %arg2[%c66] : memref<98xf32, #tpu.memory_space<smem>>
    %c18 = arith.constant 18 : index
    %43 = memref.load %arg2[%c18] : memref<98xf32, #tpu.memory_space<smem>>
    %c67 = arith.constant 67 : index
    %44 = memref.load %arg2[%c67] : memref<98xf32, #tpu.memory_space<smem>>
    %c19 = arith.constant 19 : index
    %45 = memref.load %arg2[%c19] : memref<98xf32, #tpu.memory_space<smem>>
    %c68 = arith.constant 68 : index
    %46 = memref.load %arg2[%c68] : memref<98xf32, #tpu.memory_space<smem>>
    %c20 = arith.constant 20 : index
    %47 = memref.load %arg2[%c20] : memref<98xf32, #tpu.memory_space<smem>>
    %c69 = arith.constant 69 : index
    %48 = memref.load %arg2[%c69] : memref<98xf32, #tpu.memory_space<smem>>
    %c21 = arith.constant 21 : index
    %49 = memref.load %arg2[%c21] : memref<98xf32, #tpu.memory_space<smem>>
    %c70 = arith.constant 70 : index
    %50 = memref.load %arg2[%c70] : memref<98xf32, #tpu.memory_space<smem>>
    %c22 = arith.constant 22 : index
    %51 = memref.load %arg2[%c22] : memref<98xf32, #tpu.memory_space<smem>>
    %c71 = arith.constant 71 : index
    %52 = memref.load %arg2[%c71] : memref<98xf32, #tpu.memory_space<smem>>
    %c23 = arith.constant 23 : index
    %53 = memref.load %arg2[%c23] : memref<98xf32, #tpu.memory_space<smem>>
    %c72 = arith.constant 72 : index
    %54 = memref.load %arg2[%c72] : memref<98xf32, #tpu.memory_space<smem>>
    %c24 = arith.constant 24 : index
    %55 = memref.load %arg2[%c24] : memref<98xf32, #tpu.memory_space<smem>>
    %c73 = arith.constant 73 : index
    %56 = memref.load %arg2[%c73] : memref<98xf32, #tpu.memory_space<smem>>
    %c25 = arith.constant 25 : index
    %57 = memref.load %arg2[%c25] : memref<98xf32, #tpu.memory_space<smem>>
    %c74 = arith.constant 74 : index
    %58 = memref.load %arg2[%c74] : memref<98xf32, #tpu.memory_space<smem>>
    %c26 = arith.constant 26 : index
    %59 = memref.load %arg2[%c26] : memref<98xf32, #tpu.memory_space<smem>>
    %c75 = arith.constant 75 : index
    %60 = memref.load %arg2[%c75] : memref<98xf32, #tpu.memory_space<smem>>
    %c27 = arith.constant 27 : index
    %61 = memref.load %arg2[%c27] : memref<98xf32, #tpu.memory_space<smem>>
    %c76 = arith.constant 76 : index
    %62 = memref.load %arg2[%c76] : memref<98xf32, #tpu.memory_space<smem>>
    %c28 = arith.constant 28 : index
    %63 = memref.load %arg2[%c28] : memref<98xf32, #tpu.memory_space<smem>>
    %c77 = arith.constant 77 : index
    %64 = memref.load %arg2[%c77] : memref<98xf32, #tpu.memory_space<smem>>
    %c29 = arith.constant 29 : index
    %65 = memref.load %arg2[%c29] : memref<98xf32, #tpu.memory_space<smem>>
    %c78 = arith.constant 78 : index
    %66 = memref.load %arg2[%c78] : memref<98xf32, #tpu.memory_space<smem>>
    %c30 = arith.constant 30 : index
    %67 = memref.load %arg2[%c30] : memref<98xf32, #tpu.memory_space<smem>>
    %c79 = arith.constant 79 : index
    %68 = memref.load %arg2[%c79] : memref<98xf32, #tpu.memory_space<smem>>
    %c31 = arith.constant 31 : index
    %69 = memref.load %arg2[%c31] : memref<98xf32, #tpu.memory_space<smem>>
    %c80 = arith.constant 80 : index
    %70 = memref.load %arg2[%c80] : memref<98xf32, #tpu.memory_space<smem>>
    %c32 = arith.constant 32 : index
    %71 = memref.load %arg2[%c32] : memref<98xf32, #tpu.memory_space<smem>>
    %c81 = arith.constant 81 : index
    %72 = memref.load %arg2[%c81] : memref<98xf32, #tpu.memory_space<smem>>
    %c33 = arith.constant 33 : index
    %73 = memref.load %arg2[%c33] : memref<98xf32, #tpu.memory_space<smem>>
    %c82 = arith.constant 82 : index
    %74 = memref.load %arg2[%c82] : memref<98xf32, #tpu.memory_space<smem>>
    %c34 = arith.constant 34 : index
    %75 = memref.load %arg2[%c34] : memref<98xf32, #tpu.memory_space<smem>>
    %c83 = arith.constant 83 : index
    %76 = memref.load %arg2[%c83] : memref<98xf32, #tpu.memory_space<smem>>
    %c35 = arith.constant 35 : index
    %77 = memref.load %arg2[%c35] : memref<98xf32, #tpu.memory_space<smem>>
    %c84 = arith.constant 84 : index
    %78 = memref.load %arg2[%c84] : memref<98xf32, #tpu.memory_space<smem>>
    %c36 = arith.constant 36 : index
    %79 = memref.load %arg2[%c36] : memref<98xf32, #tpu.memory_space<smem>>
    %c85 = arith.constant 85 : index
    %80 = memref.load %arg2[%c85] : memref<98xf32, #tpu.memory_space<smem>>
    %c37 = arith.constant 37 : index
    %81 = memref.load %arg2[%c37] : memref<98xf32, #tpu.memory_space<smem>>
    %c86 = arith.constant 86 : index
    %82 = memref.load %arg2[%c86] : memref<98xf32, #tpu.memory_space<smem>>
    %c38 = arith.constant 38 : index
    %83 = memref.load %arg2[%c38] : memref<98xf32, #tpu.memory_space<smem>>
    %c87 = arith.constant 87 : index
    %84 = memref.load %arg2[%c87] : memref<98xf32, #tpu.memory_space<smem>>
    %c39 = arith.constant 39 : index
    %85 = memref.load %arg2[%c39] : memref<98xf32, #tpu.memory_space<smem>>
    %c88 = arith.constant 88 : index
    %86 = memref.load %arg2[%c88] : memref<98xf32, #tpu.memory_space<smem>>
    %c40 = arith.constant 40 : index
    %87 = memref.load %arg2[%c40] : memref<98xf32, #tpu.memory_space<smem>>
    %c89 = arith.constant 89 : index
    %88 = memref.load %arg2[%c89] : memref<98xf32, #tpu.memory_space<smem>>
    %c41 = arith.constant 41 : index
    %89 = memref.load %arg2[%c41] : memref<98xf32, #tpu.memory_space<smem>>
    %c90 = arith.constant 90 : index
    %90 = memref.load %arg2[%c90] : memref<98xf32, #tpu.memory_space<smem>>
    %c42 = arith.constant 42 : index
    %91 = memref.load %arg2[%c42] : memref<98xf32, #tpu.memory_space<smem>>
    %c91 = arith.constant 91 : index
    %92 = memref.load %arg2[%c91] : memref<98xf32, #tpu.memory_space<smem>>
    %c43 = arith.constant 43 : index
    %93 = memref.load %arg2[%c43] : memref<98xf32, #tpu.memory_space<smem>>
    %c92 = arith.constant 92 : index
    %94 = memref.load %arg2[%c92] : memref<98xf32, #tpu.memory_space<smem>>
    %c44 = arith.constant 44 : index
    %95 = memref.load %arg2[%c44] : memref<98xf32, #tpu.memory_space<smem>>
    %c93 = arith.constant 93 : index
    %96 = memref.load %arg2[%c93] : memref<98xf32, #tpu.memory_space<smem>>
    %c45 = arith.constant 45 : index
    %97 = memref.load %arg2[%c45] : memref<98xf32, #tpu.memory_space<smem>>
    %c94 = arith.constant 94 : index
    %98 = memref.load %arg2[%c94] : memref<98xf32, #tpu.memory_space<smem>>
    %c46 = arith.constant 46 : index
    %99 = memref.load %arg2[%c46] : memref<98xf32, #tpu.memory_space<smem>>
    %c95 = arith.constant 95 : index
    %100 = memref.load %arg2[%c95] : memref<98xf32, #tpu.memory_space<smem>>
    %c47 = arith.constant 47 : index
    %101 = memref.load %arg2[%c47] : memref<98xf32, #tpu.memory_space<smem>>
    %c96 = arith.constant 96 : index
    %102 = memref.load %arg2[%c96] : memref<98xf32, #tpu.memory_space<smem>>
    %c48 = arith.constant 48 : index
    %103 = memref.load %arg2[%c48] : memref<98xf32, #tpu.memory_space<smem>>
    %c97 = arith.constant 97 : index
    %104 = memref.load %arg2[%c97] : memref<98xf32, #tpu.memory_space<smem>>
    %105 = tpu.iota {dimensions = array<i32: 0>} : vector<8x1xi32>
    %c4_i32 = arith.constant 4 : i32
    %106 = vector.broadcast %c4_i32 : i32 to vector<8x1xi32>
    %107 = arith.cmpi slt, %105, %106 : vector<8x1xi32>
    %108 = tpu.iota {dimensions = array<i32: 1>} : vector<1x256xi32>
    %c15_i32 = arith.constant 15 : i32
    %109 = vector.broadcast %c15_i32 : i32 to vector<1x256xi32>
    %110 = arith.andi %108, %109 : vector<1x256xi32>
    %cst_10 = arith.constant 0.000000e+00 : f32
    %111 = vector.broadcast %cst_10 : f32 to vector<8x256xf32>
    %cst_11 = arith.constant 0.000000e+00 : f32
    %112 = vector.broadcast %cst_11 : f32 to vector<8x256xf32>
    %c0_12 = arith.constant 0 : index
    %c77_13 = arith.constant 77 : index
    %113 = vector.load %arg4[%c0_12, %c77_13] : memref<8x512xf32, #tpu.memory_space<vmem>>, vector<8x256xf32>
    %114 = vector.broadcast %7 : f32 to vector<8x1xf32>
    %115 = vector.broadcast %8 : f32 to vector<8x1xf32>
    %116 = arith.select %107, %114, %115 : vector<8x1xi1>, vector<8x1xf32>
    %117 = vector.broadcast %116 : vector<8x1xf32> to vector<8x256xf32>
    %118 = arith.mulf %117, %113 : vector<8x256xf32>
    %119 = arith.addf %112, %118 : vector<8x256xf32>
    %c0_14 = arith.constant 0 : index
    %c93_15 = arith.constant 93 : index
    %120 = vector.load %arg4[%c0_14, %c93_15] : memref<8x512xf32, #tpu.memory_space<vmem>>, vector<8x256xf32>
    %121 = vector.broadcast %21 : f32 to vector<8x1xf32>
    %122 = vector.broadcast %22 : f32 to vector<8x1xf32>
    %123 = arith.select %107, %121, %122 : vector<8x1xi1>, vector<8x1xf32>
    %124 = vector.broadcast %123 : vector<8x1xf32> to vector<8x256xf32>
    %125 = arith.mulf %124, %120 : vector<8x256xf32>
    %126 = arith.addf %119, %125 : vector<8x256xf32>
    %c0_16 = arith.constant 0 : index
    %c109 = arith.constant 109 : index
    %127 = vector.load %arg4[%c0_16, %c109] : memref<8x512xf32, #tpu.memory_space<vmem>>, vector<8x256xf32>
    %128 = vector.broadcast %35 : f32 to vector<8x1xf32>
    %129 = vector.broadcast %36 : f32 to vector<8x1xf32>
    %130 = arith.select %107, %128, %129 : vector<8x1xi1>, vector<8x1xf32>
    %131 = vector.broadcast %130 : vector<8x1xf32> to vector<8x256xf32>
    %132 = arith.mulf %131, %127 : vector<8x256xf32>
    %133 = arith.addf %126, %132 : vector<8x256xf32>
    %c0_17 = arith.constant 0 : index
    %c125 = arith.constant 125 : index
    %134 = vector.load %arg4[%c0_17, %c125] : memref<8x512xf32, #tpu.memory_space<vmem>>, vector<8x256xf32>
    %135 = vector.broadcast %49 : f32 to vector<8x1xf32>
    %136 = vector.broadcast %50 : f32 to vector<8x1xf32>
    %137 = arith.select %107, %135, %136 : vector<8x1xi1>, vector<8x1xf32>
    %138 = vector.broadcast %137 : vector<8x1xf32> to vector<8x256xf32>
    %139 = arith.mulf %138, %134 : vector<8x256xf32>
    %140 = arith.addf %133, %139 : vector<8x256xf32>
    %c0_18 = arith.constant 0 : index
    %c141 = arith.constant 141 : index
    %141 = vector.load %arg4[%c0_18, %c141] : memref<8x512xf32, #tpu.memory_space<vmem>>, vector<8x256xf32>
    %142 = vector.broadcast %63 : f32 to vector<8x1xf32>
    %143 = vector.broadcast %64 : f32 to vector<8x1xf32>
    %144 = arith.select %107, %142, %143 : vector<8x1xi1>, vector<8x1xf32>
    %145 = vector.broadcast %144 : vector<8x1xf32> to vector<8x256xf32>
    %146 = arith.mulf %145, %141 : vector<8x256xf32>
    %147 = arith.addf %140, %146 : vector<8x256xf32>
    %c0_19 = arith.constant 0 : index
    %c157 = arith.constant 157 : index
    %148 = vector.load %arg4[%c0_19, %c157] : memref<8x512xf32, #tpu.memory_space<vmem>>, vector<8x256xf32>
    %149 = vector.broadcast %77 : f32 to vector<8x1xf32>
    %150 = vector.broadcast %78 : f32 to vector<8x1xf32>
    %151 = arith.select %107, %149, %150 : vector<8x1xi1>, vector<8x1xf32>
    %152 = vector.broadcast %151 : vector<8x1xf32> to vector<8x256xf32>
    %153 = arith.mulf %152, %148 : vector<8x256xf32>
    %154 = arith.addf %147, %153 : vector<8x256xf32>
    %c0_20 = arith.constant 0 : index
    %c173 = arith.constant 173 : index
    %155 = vector.load %arg4[%c0_20, %c173] : memref<8x512xf32, #tpu.memory_space<vmem>>, vector<8x256xf32>
    %156 = vector.broadcast %91 : f32 to vector<8x1xf32>
    %157 = vector.broadcast %92 : f32 to vector<8x1xf32>
    %158 = arith.select %107, %156, %157 : vector<8x1xi1>, vector<8x1xf32>
    %159 = vector.broadcast %158 : vector<8x1xf32> to vector<8x256xf32>
    %160 = arith.mulf %159, %155 : vector<8x256xf32>
    %161 = arith.addf %154, %160 : vector<8x256xf32>
    %c3_i32 = arith.constant 3 : i32
    %162 = vector.broadcast %c3_i32 : i32 to vector<1x256xi32>
    %163 = arith.cmpi sge, %110, %162 : vector<1x256xi32>
    %c19_i32 = arith.constant 19 : i32
    %164 = vector.broadcast %c19_i32 : i32 to vector<1x256xi32>
    %165 = arith.cmpi slt, %110, %164 : vector<1x256xi32>
    %166 = arith.andi %163, %165 : vector<1x256xi1>
    %167 = arith.extui %166 : vector<1x256xi1> to vector<1x256xi32>
    %168 = arith.sitofp %167 : vector<1x256xi32> to vector<1x256xf32>
    %169 = vector.broadcast %168 : vector<1x256xf32> to vector<8x256xf32>
    %170 = arith.mulf %161, %169 : vector<8x256xf32>
    %171 = arith.addf %111, %170 : vector<8x256xf32>
    %cst_21 = arith.constant 0.000000e+00 : f32
    %172 = vector.broadcast %cst_21 : f32 to vector<8x256xf32>
    %c0_22 = arith.constant 0 : index
    %c78_23 = arith.constant 78 : index
    %173 = vector.load %arg4[%c0_22, %c78_23] : memref<8x512xf32, #tpu.memory_space<vmem>>, vector<8x256xf32>
    %174 = vector.broadcast %9 : f32 to vector<8x1xf32>
    %175 = vector.broadcast %10 : f32 to vector<8x1xf32>
    %176 = arith.select %107, %174, %175 : vector<8x1xi1>, vector<8x1xf32>
    %177 = vector.broadcast %176 : vector<8x1xf32> to vector<8x256xf32>
    %178 = arith.mulf %177, %173 : vector<8x256xf32>
    %179 = arith.addf %172, %178 : vector<8x256xf32>
    %c0_24 = arith.constant 0 : index
    %c94_25 = arith.constant 94 : index
    %180 = vector.load %arg4[%c0_24, %c94_25] : memref<8x512xf32, #tpu.memory_space<vmem>>, vector<8x256xf32>
    %181 = vector.broadcast %23 : f32 to vector<8x1xf32>
    %182 = vector.broadcast %24 : f32 to vector<8x1xf32>
    %183 = arith.select %107, %181, %182 : vector<8x1xi1>, vector<8x1xf32>
    %184 = vector.broadcast %183 : vector<8x1xf32> to vector<8x256xf32>
    %185 = arith.mulf %184, %180 : vector<8x256xf32>
    %186 = arith.addf %179, %185 : vector<8x256xf32>
    %c0_26 = arith.constant 0 : index
    %c110 = arith.constant 110 : index
    %187 = vector.load %arg4[%c0_26, %c110] : memref<8x512xf32, #tpu.memory_space<vmem>>, vector<8x256xf32>
    %188 = vector.broadcast %37 : f32 to vector<8x1xf32>
    %189 = vector.broadcast %38 : f32 to vector<8x1xf32>
    %190 = arith.select %107, %188, %189 : vector<8x1xi1>, vector<8x1xf32>
    %191 = vector.broadcast %190 : vector<8x1xf32> to vector<8x256xf32>
    %192 = arith.mulf %191, %187 : vector<8x256xf32>
    %193 = arith.addf %186, %192 : vector<8x256xf32>
    %c0_27 = arith.constant 0 : index
    %c126 = arith.constant 126 : index
    %194 = vector.load %arg4[%c0_27, %c126] : memref<8x512xf32, #tpu.memory_space<vmem>>, vector<8x256xf32>
    %195 = vector.broadcast %51 : f32 to vector<8x1xf32>
    %196 = vector.broadcast %52 : f32 to vector<8x1xf32>
    %197 = arith.select %107, %195, %196 : vector<8x1xi1>, vector<8x1xf32>
    %198 = vector.broadcast %197 : vector<8x1xf32> to vector<8x256xf32>
    %199 = arith.mulf %198, %194 : vector<8x256xf32>
    %200 = arith.addf %193, %199 : vector<8x256xf32>
    %c0_28 = arith.constant 0 : index
    %c142 = arith.constant 142 : index
    %201 = vector.load %arg4[%c0_28, %c142] : memref<8x512xf32, #tpu.memory_space<vmem>>, vector<8x256xf32>
    %202 = vector.broadcast %65 : f32 to vector<8x1xf32>
    %203 = vector.broadcast %66 : f32 to vector<8x1xf32>
    %204 = arith.select %107, %202, %203 : vector<8x1xi1>, vector<8x1xf32>
    %205 = vector.broadcast %204 : vector<8x1xf32> to vector<8x256xf32>
    %206 = arith.mulf %205, %201 : vector<8x256xf32>
    %207 = arith.addf %200, %206 : vector<8x256xf32>
    %c0_29 = arith.constant 0 : index
    %c158 = arith.constant 158 : index
    %208 = vector.load %arg4[%c0_29, %c158] : memref<8x512xf32, #tpu.memory_space<vmem>>, vector<8x256xf32>
    %209 = vector.broadcast %79 : f32 to vector<8x1xf32>
    %210 = vector.broadcast %80 : f32 to vector<8x1xf32>
    %211 = arith.select %107, %209, %210 : vector<8x1xi1>, vector<8x1xf32>
    %212 = vector.broadcast %211 : vector<8x1xf32> to vector<8x256xf32>
    %213 = arith.mulf %212, %208 : vector<8x256xf32>
    %214 = arith.addf %207, %213 : vector<8x256xf32>
    %c0_30 = arith.constant 0 : index
    %c174 = arith.constant 174 : index
    %215 = vector.load %arg4[%c0_30, %c174] : memref<8x512xf32, #tpu.memory_space<vmem>>, vector<8x256xf32>
    %216 = vector.broadcast %93 : f32 to vector<8x1xf32>
    %217 = vector.broadcast %94 : f32 to vector<8x1xf32>
    %218 = arith.select %107, %216, %217 : vector<8x1xi1>, vector<8x1xf32>
    %219 = vector.broadcast %218 : vector<8x1xf32> to vector<8x256xf32>
    %220 = arith.mulf %219, %215 : vector<8x256xf32>
    %221 = arith.addf %214, %220 : vector<8x256xf32>
    %c2_i32 = arith.constant 2 : i32
    %222 = vector.broadcast %c2_i32 : i32 to vector<1x256xi32>
    %223 = arith.cmpi sge, %110, %222 : vector<1x256xi32>
    %c18_i32 = arith.constant 18 : i32
    %224 = vector.broadcast %c18_i32 : i32 to vector<1x256xi32>
    %225 = arith.cmpi slt, %110, %224 : vector<1x256xi32>
    %226 = arith.andi %223, %225 : vector<1x256xi1>
    %227 = arith.extui %226 : vector<1x256xi1> to vector<1x256xi32>
    %228 = arith.sitofp %227 : vector<1x256xi32> to vector<1x256xf32>
    %229 = vector.broadcast %228 : vector<1x256xf32> to vector<8x256xf32>
    %230 = arith.mulf %221, %229 : vector<8x256xf32>
    %231 = arith.addf %171, %230 : vector<8x256xf32>
    %cst_31 = arith.constant 0.000000e+00 : f32
    %232 = vector.broadcast %cst_31 : f32 to vector<8x256xf32>
    %c0_32 = arith.constant 0 : index
    %c79_33 = arith.constant 79 : index
    %233 = vector.load %arg4[%c0_32, %c79_33] : memref<8x512xf32, #tpu.memory_space<vmem>>, vector<8x256xf32>
    %234 = vector.broadcast %11 : f32 to vector<8x1xf32>
    %235 = vector.broadcast %12 : f32 to vector<8x1xf32>
    %236 = arith.select %107, %234, %235 : vector<8x1xi1>, vector<8x1xf32>
    %237 = vector.broadcast %236 : vector<8x1xf32> to vector<8x256xf32>
    %238 = arith.mulf %237, %233 : vector<8x256xf32>
    %239 = arith.addf %232, %238 : vector<8x256xf32>
    %c0_34 = arith.constant 0 : index
    %c95_35 = arith.constant 95 : index
    %240 = vector.load %arg4[%c0_34, %c95_35] : memref<8x512xf32, #tpu.memory_space<vmem>>, vector<8x256xf32>
    %241 = vector.broadcast %25 : f32 to vector<8x1xf32>
    %242 = vector.broadcast %26 : f32 to vector<8x1xf32>
    %243 = arith.select %107, %241, %242 : vector<8x1xi1>, vector<8x1xf32>
    %244 = vector.broadcast %243 : vector<8x1xf32> to vector<8x256xf32>
    %245 = arith.mulf %244, %240 : vector<8x256xf32>
    %246 = arith.addf %239, %245 : vector<8x256xf32>
    %c0_36 = arith.constant 0 : index
    %c111 = arith.constant 111 : index
    %247 = vector.load %arg4[%c0_36, %c111] : memref<8x512xf32, #tpu.memory_space<vmem>>, vector<8x256xf32>
    %248 = vector.broadcast %39 : f32 to vector<8x1xf32>
    %249 = vector.broadcast %40 : f32 to vector<8x1xf32>
    %250 = arith.select %107, %248, %249 : vector<8x1xi1>, vector<8x1xf32>
    %251 = vector.broadcast %250 : vector<8x1xf32> to vector<8x256xf32>
    %252 = arith.mulf %251, %247 : vector<8x256xf32>
    %253 = arith.addf %246, %252 : vector<8x256xf32>
    %c0_37 = arith.constant 0 : index
    %c127 = arith.constant 127 : index
    %254 = vector.load %arg4[%c0_37, %c127] : memref<8x512xf32, #tpu.memory_space<vmem>>, vector<8x256xf32>
    %255 = vector.broadcast %53 : f32 to vector<8x1xf32>
    %256 = vector.broadcast %54 : f32 to vector<8x1xf32>
    %257 = arith.select %107, %255, %256 : vector<8x1xi1>, vector<8x1xf32>
    %258 = vector.broadcast %257 : vector<8x1xf32> to vector<8x256xf32>
    %259 = arith.mulf %258, %254 : vector<8x256xf32>
    %260 = arith.addf %253, %259 : vector<8x256xf32>
    %c0_38 = arith.constant 0 : index
    %c143 = arith.constant 143 : index
    %261 = vector.load %arg4[%c0_38, %c143] : memref<8x512xf32, #tpu.memory_space<vmem>>, vector<8x256xf32>
    %262 = vector.broadcast %67 : f32 to vector<8x1xf32>
    %263 = vector.broadcast %68 : f32 to vector<8x1xf32>
    %264 = arith.select %107, %262, %263 : vector<8x1xi1>, vector<8x1xf32>
    %265 = vector.broadcast %264 : vector<8x1xf32> to vector<8x256xf32>
    %266 = arith.mulf %265, %261 : vector<8x256xf32>
    %267 = arith.addf %260, %266 : vector<8x256xf32>
    %c0_39 = arith.constant 0 : index
    %c159 = arith.constant 159 : index
    %268 = vector.load %arg4[%c0_39, %c159] : memref<8x512xf32, #tpu.memory_space<vmem>>, vector<8x256xf32>
    %269 = vector.broadcast %81 : f32 to vector<8x1xf32>
    %270 = vector.broadcast %82 : f32 to vector<8x1xf32>
    %271 = arith.select %107, %269, %270 : vector<8x1xi1>, vector<8x1xf32>
    %272 = vector.broadcast %271 : vector<8x1xf32> to vector<8x256xf32>
    %273 = arith.mulf %272, %268 : vector<8x256xf32>
    %274 = arith.addf %267, %273 : vector<8x256xf32>
    %c0_40 = arith.constant 0 : index
    %c175 = arith.constant 175 : index
    %275 = vector.load %arg4[%c0_40, %c175] : memref<8x512xf32, #tpu.memory_space<vmem>>, vector<8x256xf32>
    %276 = vector.broadcast %95 : f32 to vector<8x1xf32>
    %277 = vector.broadcast %96 : f32 to vector<8x1xf32>
    %278 = arith.select %107, %276, %277 : vector<8x1xi1>, vector<8x1xf32>
    %279 = vector.broadcast %278 : vector<8x1xf32> to vector<8x256xf32>
    %280 = arith.mulf %279, %275 : vector<8x256xf32>
    %281 = arith.addf %274, %280 : vector<8x256xf32>
    %c1_i32 = arith.constant 1 : i32
    %282 = vector.broadcast %c1_i32 : i32 to vector<1x256xi32>
    %283 = arith.cmpi sge, %110, %282 : vector<1x256xi32>
    %c17_i32 = arith.constant 17 : i32
    %284 = vector.broadcast %c17_i32 : i32 to vector<1x256xi32>
    %285 = arith.cmpi slt, %110, %284 : vector<1x256xi32>
    %286 = arith.andi %283, %285 : vector<1x256xi1>
    %287 = arith.extui %286 : vector<1x256xi1> to vector<1x256xi32>
    %288 = arith.sitofp %287 : vector<1x256xi32> to vector<1x256xf32>
    %289 = vector.broadcast %288 : vector<1x256xf32> to vector<8x256xf32>
    %290 = arith.mulf %281, %289 : vector<8x256xf32>
    %291 = arith.addf %231, %290 : vector<8x256xf32>
    %cst_41 = arith.constant 0.000000e+00 : f32
    %292 = vector.broadcast %cst_41 : f32 to vector<8x256xf32>
    %c0_42 = arith.constant 0 : index
    %c80_43 = arith.constant 80 : index
    %293 = vector.load %arg4[%c0_42, %c80_43] : memref<8x512xf32, #tpu.memory_space<vmem>>, vector<8x256xf32>
    %294 = vector.broadcast %13 : f32 to vector<8x1xf32>
    %295 = vector.broadcast %14 : f32 to vector<8x1xf32>
    %296 = arith.select %107, %294, %295 : vector<8x1xi1>, vector<8x1xf32>
    %297 = vector.broadcast %296 : vector<8x1xf32> to vector<8x256xf32>
    %298 = arith.mulf %297, %293 : vector<8x256xf32>
    %299 = arith.addf %292, %298 : vector<8x256xf32>
    %c0_44 = arith.constant 0 : index
    %c96_45 = arith.constant 96 : index
    %300 = vector.load %arg4[%c0_44, %c96_45] : memref<8x512xf32, #tpu.memory_space<vmem>>, vector<8x256xf32>
    %301 = vector.broadcast %27 : f32 to vector<8x1xf32>
    %302 = vector.broadcast %28 : f32 to vector<8x1xf32>
    %303 = arith.select %107, %301, %302 : vector<8x1xi1>, vector<8x1xf32>
    %304 = vector.broadcast %303 : vector<8x1xf32> to vector<8x256xf32>
    %305 = arith.mulf %304, %300 : vector<8x256xf32>
    %306 = arith.addf %299, %305 : vector<8x256xf32>
    %c0_46 = arith.constant 0 : index
    %c112 = arith.constant 112 : index
    %307 = vector.load %arg4[%c0_46, %c112] : memref<8x512xf32, #tpu.memory_space<vmem>>, vector<8x256xf32>
    %308 = vector.broadcast %41 : f32 to vector<8x1xf32>
    %309 = vector.broadcast %42 : f32 to vector<8x1xf32>
    %310 = arith.select %107, %308, %309 : vector<8x1xi1>, vector<8x1xf32>
    %311 = vector.broadcast %310 : vector<8x1xf32> to vector<8x256xf32>
    %312 = arith.mulf %311, %307 : vector<8x256xf32>
    %313 = arith.addf %306, %312 : vector<8x256xf32>
    %c0_47 = arith.constant 0 : index
    %c128_48 = arith.constant 128 : index
    %314 = vector.load %arg4[%c0_47, %c128_48] : memref<8x512xf32, #tpu.memory_space<vmem>>, vector<8x256xf32>
    %315 = vector.broadcast %55 : f32 to vector<8x1xf32>
    %316 = vector.broadcast %56 : f32 to vector<8x1xf32>
    %317 = arith.select %107, %315, %316 : vector<8x1xi1>, vector<8x1xf32>
    %318 = vector.broadcast %317 : vector<8x1xf32> to vector<8x256xf32>
    %319 = arith.mulf %318, %314 : vector<8x256xf32>
    %320 = arith.addf %313, %319 : vector<8x256xf32>
    %c0_49 = arith.constant 0 : index
    %c144 = arith.constant 144 : index
    %321 = vector.load %arg4[%c0_49, %c144] : memref<8x512xf32, #tpu.memory_space<vmem>>, vector<8x256xf32>
    %322 = vector.broadcast %69 : f32 to vector<8x1xf32>
    %323 = vector.broadcast %70 : f32 to vector<8x1xf32>
    %324 = arith.select %107, %322, %323 : vector<8x1xi1>, vector<8x1xf32>
    %325 = vector.broadcast %324 : vector<8x1xf32> to vector<8x256xf32>
    %326 = arith.mulf %325, %321 : vector<8x256xf32>
    %327 = arith.addf %320, %326 : vector<8x256xf32>
    %c0_50 = arith.constant 0 : index
    %c160 = arith.constant 160 : index
    %328 = vector.load %arg4[%c0_50, %c160] : memref<8x512xf32, #tpu.memory_space<vmem>>, vector<8x256xf32>
    %329 = vector.broadcast %83 : f32 to vector<8x1xf32>
    %330 = vector.broadcast %84 : f32 to vector<8x1xf32>
    %331 = arith.select %107, %329, %330 : vector<8x1xi1>, vector<8x1xf32>
    %332 = vector.broadcast %331 : vector<8x1xf32> to vector<8x256xf32>
    %333 = arith.mulf %332, %328 : vector<8x256xf32>
    %334 = arith.addf %327, %333 : vector<8x256xf32>
    %c0_51 = arith.constant 0 : index
    %c176 = arith.constant 176 : index
    %335 = vector.load %arg4[%c0_51, %c176] : memref<8x512xf32, #tpu.memory_space<vmem>>, vector<8x256xf32>
    %336 = vector.broadcast %97 : f32 to vector<8x1xf32>
    %337 = vector.broadcast %98 : f32 to vector<8x1xf32>
    %338 = arith.select %107, %336, %337 : vector<8x1xi1>, vector<8x1xf32>
    %339 = vector.broadcast %338 : vector<8x1xf32> to vector<8x256xf32>
    %340 = arith.mulf %339, %335 : vector<8x256xf32>
    %341 = arith.addf %334, %340 : vector<8x256xf32>
    %c0_i32 = arith.constant 0 : i32
    %342 = vector.broadcast %c0_i32 : i32 to vector<1x256xi32>
    %343 = arith.cmpi sge, %110, %342 : vector<1x256xi32>
    %c16_i32 = arith.constant 16 : i32
    %344 = vector.broadcast %c16_i32 : i32 to vector<1x256xi32>
    %345 = arith.cmpi slt, %110, %344 : vector<1x256xi32>
    %346 = arith.andi %343, %345 : vector<1x256xi1>
    %347 = arith.extui %346 : vector<1x256xi1> to vector<1x256xi32>
    %348 = arith.sitofp %347 : vector<1x256xi32> to vector<1x256xf32>
    %349 = vector.broadcast %348 : vector<1x256xf32> to vector<8x256xf32>
    %350 = arith.mulf %341, %349 : vector<8x256xf32>
    %351 = arith.addf %291, %350 : vector<8x256xf32>
    %cst_52 = arith.constant 0.000000e+00 : f32
    %352 = vector.broadcast %cst_52 : f32 to vector<8x256xf32>
    %c0_53 = arith.constant 0 : index
    %c81_54 = arith.constant 81 : index
    %353 = vector.load %arg4[%c0_53, %c81_54] : memref<8x512xf32, #tpu.memory_space<vmem>>, vector<8x256xf32>
    %354 = vector.broadcast %15 : f32 to vector<8x1xf32>
    %355 = vector.broadcast %16 : f32 to vector<8x1xf32>
    %356 = arith.select %107, %354, %355 : vector<8x1xi1>, vector<8x1xf32>
    %357 = vector.broadcast %356 : vector<8x1xf32> to vector<8x256xf32>
    %358 = arith.mulf %357, %353 : vector<8x256xf32>
    %359 = arith.addf %352, %358 : vector<8x256xf32>
    %c0_55 = arith.constant 0 : index
    %c97_56 = arith.constant 97 : index
    %360 = vector.load %arg4[%c0_55, %c97_56] : memref<8x512xf32, #tpu.memory_space<vmem>>, vector<8x256xf32>
    %361 = vector.broadcast %29 : f32 to vector<8x1xf32>
    %362 = vector.broadcast %30 : f32 to vector<8x1xf32>
    %363 = arith.select %107, %361, %362 : vector<8x1xi1>, vector<8x1xf32>
    %364 = vector.broadcast %363 : vector<8x1xf32> to vector<8x256xf32>
    %365 = arith.mulf %364, %360 : vector<8x256xf32>
    %366 = arith.addf %359, %365 : vector<8x256xf32>
    %c0_57 = arith.constant 0 : index
    %c113 = arith.constant 113 : index
    %367 = vector.load %arg4[%c0_57, %c113] : memref<8x512xf32, #tpu.memory_space<vmem>>, vector<8x256xf32>
    %368 = vector.broadcast %43 : f32 to vector<8x1xf32>
    %369 = vector.broadcast %44 : f32 to vector<8x1xf32>
    %370 = arith.select %107, %368, %369 : vector<8x1xi1>, vector<8x1xf32>
    %371 = vector.broadcast %370 : vector<8x1xf32> to vector<8x256xf32>
    %372 = arith.mulf %371, %367 : vector<8x256xf32>
    %373 = arith.addf %366, %372 : vector<8x256xf32>
    %c0_58 = arith.constant 0 : index
    %c129 = arith.constant 129 : index
    %374 = vector.load %arg4[%c0_58, %c129] : memref<8x512xf32, #tpu.memory_space<vmem>>, vector<8x256xf32>
    %375 = vector.broadcast %57 : f32 to vector<8x1xf32>
    %376 = vector.broadcast %58 : f32 to vector<8x1xf32>
    %377 = arith.select %107, %375, %376 : vector<8x1xi1>, vector<8x1xf32>
    %378 = vector.broadcast %377 : vector<8x1xf32> to vector<8x256xf32>
    %379 = arith.mulf %378, %374 : vector<8x256xf32>
    %380 = arith.addf %373, %379 : vector<8x256xf32>
    %c0_59 = arith.constant 0 : index
    %c145 = arith.constant 145 : index
    %381 = vector.load %arg4[%c0_59, %c145] : memref<8x512xf32, #tpu.memory_space<vmem>>, vector<8x256xf32>
    %382 = vector.broadcast %71 : f32 to vector<8x1xf32>
    %383 = vector.broadcast %72 : f32 to vector<8x1xf32>
    %384 = arith.select %107, %382, %383 : vector<8x1xi1>, vector<8x1xf32>
    %385 = vector.broadcast %384 : vector<8x1xf32> to vector<8x256xf32>
    %386 = arith.mulf %385, %381 : vector<8x256xf32>
    %387 = arith.addf %380, %386 : vector<8x256xf32>
    %c0_60 = arith.constant 0 : index
    %c161 = arith.constant 161 : index
    %388 = vector.load %arg4[%c0_60, %c161] : memref<8x512xf32, #tpu.memory_space<vmem>>, vector<8x256xf32>
    %389 = vector.broadcast %85 : f32 to vector<8x1xf32>
    %390 = vector.broadcast %86 : f32 to vector<8x1xf32>
    %391 = arith.select %107, %389, %390 : vector<8x1xi1>, vector<8x1xf32>
    %392 = vector.broadcast %391 : vector<8x1xf32> to vector<8x256xf32>
    %393 = arith.mulf %392, %388 : vector<8x256xf32>
    %394 = arith.addf %387, %393 : vector<8x256xf32>
    %c0_61 = arith.constant 0 : index
    %c177 = arith.constant 177 : index
    %395 = vector.load %arg4[%c0_61, %c177] : memref<8x512xf32, #tpu.memory_space<vmem>>, vector<8x256xf32>
    %396 = vector.broadcast %99 : f32 to vector<8x1xf32>
    %397 = vector.broadcast %100 : f32 to vector<8x1xf32>
    %398 = arith.select %107, %396, %397 : vector<8x1xi1>, vector<8x1xf32>
    %399 = vector.broadcast %398 : vector<8x1xf32> to vector<8x256xf32>
    %400 = arith.mulf %399, %395 : vector<8x256xf32>
    %401 = arith.addf %394, %400 : vector<8x256xf32>
    %c-1_i32 = arith.constant -1 : i32
    %402 = vector.broadcast %c-1_i32 : i32 to vector<1x256xi32>
    %403 = arith.cmpi sge, %110, %402 : vector<1x256xi32>
    %c15_i32_62 = arith.constant 15 : i32
    %404 = vector.broadcast %c15_i32_62 : i32 to vector<1x256xi32>
    %405 = arith.cmpi slt, %110, %404 : vector<1x256xi32>
    %406 = arith.andi %403, %405 : vector<1x256xi1>
    %407 = arith.extui %406 : vector<1x256xi1> to vector<1x256xi32>
    %408 = arith.sitofp %407 : vector<1x256xi32> to vector<1x256xf32>
    %409 = vector.broadcast %408 : vector<1x256xf32> to vector<8x256xf32>
    %410 = arith.mulf %401, %409 : vector<8x256xf32>
    %411 = arith.addf %351, %410 : vector<8x256xf32>
    %cst_63 = arith.constant 0.000000e+00 : f32
    %412 = vector.broadcast %cst_63 : f32 to vector<8x256xf32>
    %c0_64 = arith.constant 0 : index
    %c82_65 = arith.constant 82 : index
    %413 = vector.load %arg4[%c0_64, %c82_65] : memref<8x512xf32, #tpu.memory_space<vmem>>, vector<8x256xf32>
    %414 = vector.broadcast %17 : f32 to vector<8x1xf32>
    %415 = vector.broadcast %18 : f32 to vector<8x1xf32>
    %416 = arith.select %107, %414, %415 : vector<8x1xi1>, vector<8x1xf32>
    %417 = vector.broadcast %416 : vector<8x1xf32> to vector<8x256xf32>
    %418 = arith.mulf %417, %413 : vector<8x256xf32>
    %419 = arith.addf %412, %418 : vector<8x256xf32>
    %c0_66 = arith.constant 0 : index
    %c98 = arith.constant 98 : index
    %420 = vector.load %arg4[%c0_66, %c98] : memref<8x512xf32, #tpu.memory_space<vmem>>, vector<8x256xf32>
    %421 = vector.broadcast %31 : f32 to vector<8x1xf32>
    %422 = vector.broadcast %32 : f32 to vector<8x1xf32>
    %423 = arith.select %107, %421, %422 : vector<8x1xi1>, vector<8x1xf32>
    %424 = vector.broadcast %423 : vector<8x1xf32> to vector<8x256xf32>
    %425 = arith.mulf %424, %420 : vector<8x256xf32>
    %426 = arith.addf %419, %425 : vector<8x256xf32>
    %c0_67 = arith.constant 0 : index
    %c114 = arith.constant 114 : index
    %427 = vector.load %arg4[%c0_67, %c114] : memref<8x512xf32, #tpu.memory_space<vmem>>, vector<8x256xf32>
    %428 = vector.broadcast %45 : f32 to vector<8x1xf32>
    %429 = vector.broadcast %46 : f32 to vector<8x1xf32>
    %430 = arith.select %107, %428, %429 : vector<8x1xi1>, vector<8x1xf32>
    %431 = vector.broadcast %430 : vector<8x1xf32> to vector<8x256xf32>
    %432 = arith.mulf %431, %427 : vector<8x256xf32>
    %433 = arith.addf %426, %432 : vector<8x256xf32>
    %c0_68 = arith.constant 0 : index
    %c130 = arith.constant 130 : index
    %434 = vector.load %arg4[%c0_68, %c130] : memref<8x512xf32, #tpu.memory_space<vmem>>, vector<8x256xf32>
    %435 = vector.broadcast %59 : f32 to vector<8x1xf32>
    %436 = vector.broadcast %60 : f32 to vector<8x1xf32>
    %437 = arith.select %107, %435, %436 : vector<8x1xi1>, vector<8x1xf32>
    %438 = vector.broadcast %437 : vector<8x1xf32> to vector<8x256xf32>
    %439 = arith.mulf %438, %434 : vector<8x256xf32>
    %440 = arith.addf %433, %439 : vector<8x256xf32>
    %c0_69 = arith.constant 0 : index
    %c146 = arith.constant 146 : index
    %441 = vector.load %arg4[%c0_69, %c146] : memref<8x512xf32, #tpu.memory_space<vmem>>, vector<8x256xf32>
    %442 = vector.broadcast %73 : f32 to vector<8x1xf32>
    %443 = vector.broadcast %74 : f32 to vector<8x1xf32>
    %444 = arith.select %107, %442, %443 : vector<8x1xi1>, vector<8x1xf32>
    %445 = vector.broadcast %444 : vector<8x1xf32> to vector<8x256xf32>
    %446 = arith.mulf %445, %441 : vector<8x256xf32>
    %447 = arith.addf %440, %446 : vector<8x256xf32>
    %c0_70 = arith.constant 0 : index
    %c162 = arith.constant 162 : index
    %448 = vector.load %arg4[%c0_70, %c162] : memref<8x512xf32, #tpu.memory_space<vmem>>, vector<8x256xf32>
    %449 = vector.broadcast %87 : f32 to vector<8x1xf32>
    %450 = vector.broadcast %88 : f32 to vector<8x1xf32>
    %451 = arith.select %107, %449, %450 : vector<8x1xi1>, vector<8x1xf32>
    %452 = vector.broadcast %451 : vector<8x1xf32> to vector<8x256xf32>
    %453 = arith.mulf %452, %448 : vector<8x256xf32>
    %454 = arith.addf %447, %453 : vector<8x256xf32>
    %c0_71 = arith.constant 0 : index
    %c178 = arith.constant 178 : index
    %455 = vector.load %arg4[%c0_71, %c178] : memref<8x512xf32, #tpu.memory_space<vmem>>, vector<8x256xf32>
    %456 = vector.broadcast %101 : f32 to vector<8x1xf32>
    %457 = vector.broadcast %102 : f32 to vector<8x1xf32>
    %458 = arith.select %107, %456, %457 : vector<8x1xi1>, vector<8x1xf32>
    %459 = vector.broadcast %458 : vector<8x1xf32> to vector<8x256xf32>
    %460 = arith.mulf %459, %455 : vector<8x256xf32>
    %461 = arith.addf %454, %460 : vector<8x256xf32>
    %c-2_i32 = arith.constant -2 : i32
    %462 = vector.broadcast %c-2_i32 : i32 to vector<1x256xi32>
    %463 = arith.cmpi sge, %110, %462 : vector<1x256xi32>
    %c14_i32 = arith.constant 14 : i32
    %464 = vector.broadcast %c14_i32 : i32 to vector<1x256xi32>
    %465 = arith.cmpi slt, %110, %464 : vector<1x256xi32>
    %466 = arith.andi %463, %465 : vector<1x256xi1>
    %467 = arith.extui %466 : vector<1x256xi1> to vector<1x256xi32>
    %468 = arith.sitofp %467 : vector<1x256xi32> to vector<1x256xf32>
    %469 = vector.broadcast %468 : vector<1x256xf32> to vector<8x256xf32>
    %470 = arith.mulf %461, %469 : vector<8x256xf32>
    %471 = arith.addf %411, %470 : vector<8x256xf32>
    %cst_72 = arith.constant 0.000000e+00 : f32
    %472 = vector.broadcast %cst_72 : f32 to vector<8x256xf32>
    %c0_73 = arith.constant 0 : index
    %c83_74 = arith.constant 83 : index
    %473 = vector.load %arg4[%c0_73, %c83_74] : memref<8x512xf32, #tpu.memory_space<vmem>>, vector<8x256xf32>
    %474 = vector.broadcast %19 : f32 to vector<8x1xf32>
    %475 = vector.broadcast %20 : f32 to vector<8x1xf32>
    %476 = arith.select %107, %474, %475 : vector<8x1xi1>, vector<8x1xf32>
    %477 = vector.broadcast %476 : vector<8x1xf32> to vector<8x256xf32>
    %478 = arith.mulf %477, %473 : vector<8x256xf32>
    %479 = arith.addf %472, %478 : vector<8x256xf32>
    %c0_75 = arith.constant 0 : index
    %c99 = arith.constant 99 : index
    %480 = vector.load %arg4[%c0_75, %c99] : memref<8x512xf32, #tpu.memory_space<vmem>>, vector<8x256xf32>
    %481 = vector.broadcast %33 : f32 to vector<8x1xf32>
    %482 = vector.broadcast %34 : f32 to vector<8x1xf32>
    %483 = arith.select %107, %481, %482 : vector<8x1xi1>, vector<8x1xf32>
    %484 = vector.broadcast %483 : vector<8x1xf32> to vector<8x256xf32>
    %485 = arith.mulf %484, %480 : vector<8x256xf32>
    %486 = arith.addf %479, %485 : vector<8x256xf32>
    %c0_76 = arith.constant 0 : index
    %c115 = arith.constant 115 : index
    %487 = vector.load %arg4[%c0_76, %c115] : memref<8x512xf32, #tpu.memory_space<vmem>>, vector<8x256xf32>
    %488 = vector.broadcast %47 : f32 to vector<8x1xf32>
    %489 = vector.broadcast %48 : f32 to vector<8x1xf32>
    %490 = arith.select %107, %488, %489 : vector<8x1xi1>, vector<8x1xf32>
    %491 = vector.broadcast %490 : vector<8x1xf32> to vector<8x256xf32>
    %492 = arith.mulf %491, %487 : vector<8x256xf32>
    %493 = arith.addf %486, %492 : vector<8x256xf32>
    %c0_77 = arith.constant 0 : index
    %c131 = arith.constant 131 : index
    %494 = vector.load %arg4[%c0_77, %c131] : memref<8x512xf32, #tpu.memory_space<vmem>>, vector<8x256xf32>
    %495 = vector.broadcast %61 : f32 to vector<8x1xf32>
    %496 = vector.broadcast %62 : f32 to vector<8x1xf32>
    %497 = arith.select %107, %495, %496 : vector<8x1xi1>, vector<8x1xf32>
    %498 = vector.broadcast %497 : vector<8x1xf32> to vector<8x256xf32>
    %499 = arith.mulf %498, %494 : vector<8x256xf32>
    %500 = arith.addf %493, %499 : vector<8x256xf32>
    %c0_78 = arith.constant 0 : index
    %c147 = arith.constant 147 : index
    %501 = vector.load %arg4[%c0_78, %c147] : memref<8x512xf32, #tpu.memory_space<vmem>>, vector<8x256xf32>
    %502 = vector.broadcast %75 : f32 to vector<8x1xf32>
    %503 = vector.broadcast %76 : f32 to vector<8x1xf32>
    %504 = arith.select %107, %502, %503 : vector<8x1xi1>, vector<8x1xf32>
    %505 = vector.broadcast %504 : vector<8x1xf32> to vector<8x256xf32>
    %506 = arith.mulf %505, %501 : vector<8x256xf32>
    %507 = arith.addf %500, %506 : vector<8x256xf32>
    %c0_79 = arith.constant 0 : index
    %c163 = arith.constant 163 : index
    %508 = vector.load %arg4[%c0_79, %c163] : memref<8x512xf32, #tpu.memory_space<vmem>>, vector<8x256xf32>
    %509 = vector.broadcast %89 : f32 to vector<8x1xf32>
    %510 = vector.broadcast %90 : f32 to vector<8x1xf32>
    %511 = arith.select %107, %509, %510 : vector<8x1xi1>, vector<8x1xf32>
    %512 = vector.broadcast %511 : vector<8x1xf32> to vector<8x256xf32>
    %513 = arith.mulf %512, %508 : vector<8x256xf32>
    %514 = arith.addf %507, %513 : vector<8x256xf32>
    %c0_80 = arith.constant 0 : index
    %c179 = arith.constant 179 : index
    %515 = vector.load %arg4[%c0_80, %c179] : memref<8x512xf32, #tpu.memory_space<vmem>>, vector<8x256xf32>
    %516 = vector.broadcast %103 : f32 to vector<8x1xf32>
    %517 = vector.broadcast %104 : f32 to vector<8x1xf32>
    %518 = arith.select %107, %516, %517 : vector<8x1xi1>, vector<8x1xf32>
    %519 = vector.broadcast %518 : vector<8x1xf32> to vector<8x256xf32>
    %520 = arith.mulf %519, %515 : vector<8x256xf32>
    %521 = arith.addf %514, %520 : vector<8x256xf32>
    %c-3_i32 = arith.constant -3 : i32
    %522 = vector.broadcast %c-3_i32 : i32 to vector<1x256xi32>
    %523 = arith.cmpi sge, %110, %522 : vector<1x256xi32>
    %c13_i32 = arith.constant 13 : i32
    %524 = vector.broadcast %c13_i32 : i32 to vector<1x256xi32>
    %525 = arith.cmpi slt, %110, %524 : vector<1x256xi32>
    %526 = arith.andi %523, %525 : vector<1x256xi1>
    %527 = arith.extui %526 : vector<1x256xi1> to vector<1x256xi32>
    %528 = arith.sitofp %527 : vector<1x256xi32> to vector<1x256xf32>
    %529 = vector.broadcast %528 : vector<1x256xf32> to vector<8x256xf32>
    %530 = arith.mulf %521, %529 : vector<8x256xf32>
    %531 = arith.addf %471, %530 : vector<8x256xf32>
    %532 = vector.extract_strided_slice %531 {offsets = [0, 0], sizes = [4, 256], strides = [1, 1]} : vector<8x256xf32> to vector<4x256xf32>
    %533 = vector.extract_strided_slice %531 {offsets = [4, 0], sizes = [4, 256], strides = [1, 1]} : vector<8x256xf32> to vector<4x256xf32>
    %534 = arith.addf %532, %533 : vector<4x256xf32>
    %cst_81 = arith.constant 0.000000e+00 : f32
    %535 = vector.broadcast %cst_81 : f32 to vector<4x256xf32>
    %536 = arith.subf %535, %534 : vector<4x256xf32>
    %537 = math.exp %536 : vector<4x256xf32>
    %cst_82 = arith.constant 1.000000e+00 : f32
    %538 = vector.broadcast %cst_82 : f32 to vector<4x256xf32>
    %539 = arith.addf %538, %537 : vector<4x256xf32>
    %540 = tpu.reciprocal %539 : vector<4x256xf32> -> vector<4x256xf32>
    %c0_83 = arith.constant 0 : index
    %c0_84 = arith.constant 0 : index
    %c0_85 = arith.constant 0 : index
    %541 = vector.load %arg3[%c0_83, %c0_84, %c0_85] : memref<4x1x256xf32, #tpu.memory_space<vmem>>, vector<4x1x256xf32>
    %542 = vector.shape_cast %541 : vector<4x1x256xf32> to vector<4x256xf32>
    %543 = vector.shape_cast %540 : vector<4x256xf32> to vector<4x1x256xf32>
    tpu.vector_store %arg3[%c0_83, %c0_84, %c0_85], %543 {strides = array<i32>} : memref<4x1x256xf32, #tpu.memory_space<vmem>>, vector<4x1x256xf32>,
    return
  }
  func.func @transform_0(%arg0: i32) -> (i32, i32, i32) {
    %c0_i32 = arith.constant 0 : i32
    %c0_i32_0 = arith.constant 0 : i32
    %c0_i32_1 = arith.constant 0 : i32
    return %arg0, %c0_i32, %c0_i32_0 : i32, i32, i32
  }
  func.func @transform_1(%arg0: i32) -> i32 {
    %c0_i32 = arith.constant 0 : i32
    %c0_i32_0 = arith.constant 0 : i32
    return %c0_i32 : i32
  }
  func.func @transform_2(%arg0: i32) -> (i32, i32, i32) {
    %c0_i32 = arith.constant 0 : i32
    %c0_i32_0 = arith.constant 0 : i32
    %c0_i32_1 = arith.constant 0 : i32
    return %arg0, %c0_i32, %c0_i32_0 : i32, i32, i32
  }
}

</mosaic_0001>

<bundles_post_ra>
// kernel: tpu_custom_call.1
= control target key start
LH: loop header
LB: loop body
LE: loop exit
PB: predicated region body
PF: predicated region fallthrough
CT: control target
= control target key end

     0   :  { %7 = vsyncpa [#allocation4], 0  ;;  %s3603_s0 = inlined_call_operand.hbm [shape: f32[8,16,256], index: 0, kind: input, shape index: {}]   ;;  %s3604_s1 = inlined_call_operand.vmem [shape: f32[98], index: 1, kind: input, shape index: {}]   ;;  %s3605_s2 = inlined_call_operand.hbm [shape: f32[8,1,256], index: 2, kind: output, shape index: {}]  }
   0x1   :  { %9 = vsyncpa [#allocation4 + $0x1], 0 }
   0x2   :  { %10 = vsyncpa [#allocation6], 0 }
   0x3   :  { %11 = vsyncpa [#allocation5], 0 }
   0x4   :  { %13 = vsyncpa [#allocation5 + $0x1], 0  ;;  %s2385_s9 = smov 0   ;;  %s2387_s10 = smov 0  }
   0x5   :  { %s2389_s11 = smov 0   ;;  %s2391_s12 = smov 0  }
   0x6 LB: > { %s2406_s13 = sadd.s32 4294967295, %s2340_s12   ;;  %s1965_s14 = sadd.s32 4294967294, %s2340_s12   ;;  %s2340_s12 = sphi %s2391_s12, %s3722_s12   ;;  %s2336_s11 = sphi %s2389_s11, %s3721_s11   ;;  %s2332_s10 = sphi %s2387_s10, %s3720_s10   ;;  %s2328_s9 = sphi %s2385_s9, %s3719_s9  }
   0x7   : > { %s2410_s15 = sadd.s32 1, %s2340_s12   ;;  %s26_s16 = sadd.s32 1, %s2336_s11 }
   0x8   : > { %s23_s17 = ssub.s32 %s2340_s12, %s2410_s15  ;;  %p33_p0 = scmp.ne.s32.totalorder %s2336_s11, %s2332_s10 }
   0x9   : > { %p24_p1 = scmp.eq.s32.totalorder %s23_s17, 0  ;;  %p34_p2 = scmp.eq.s32.totalorder %s2340_s12, 0 }
   0xa   : > { %p39_p3 = scmp.ne.s32.totalorder %s2332_s10, %s2328_s9  ;;  %p3607_p4 = scmp.eq.s32.totalorder %s2406_s13, 0 }
   0xb   : > { %s2422_s18 = scalar_select %p24_p1, %s2336_s11, %s26_s16  }
   0xc   : > { %p2424_p5 = por %p34_p2, %p33_p0  ;;  %p2430_p6 = por %p3607_p4, %p39_p3 }
   0xd   : > { %p84_p7 = scmp.eq.s32.totalorder %s2406_s13, 1  ;;  %p90_p8 = scmp.eq.s32.totalorder %s1965_s14, 1 }
   0xe   : > { %s3635_s20 = scalar_select %p2430_p6, 1, 0 }
   0xf   : > { %p1966_p9 = scmp.ge.s32.totalorder %s2340_s12, 1  ;;  %p97_p10 = scmp.lt.s32.totalorder %s2340_s12, 3 }
  0x10   : > { %p2437_p11 = por %p84_p7, %p33_p0  ;;  %p2441_p12 = por %p90_p8, %p39_p3 }
  0x11   : > { %p2445_p13 = pnand %p1966_p9, %p97_p10  ;;  %s110_s26 = sshll.u32 %s3604_s1, 4  ;;  %s111_s26 = int_to_ptr.vmem [resolvable:$true] %s110_s26 }
  0x12   : > { %s3636_s21 = scalar_select %p2437_p11, 1, 0 }
  0x13   : > { %s3637_s22 = scalar_select %p2441_p12, 1, 0 }
  0x14   : > { %s3638_s23 = scalar_select %p2445_p13, 1, 0 }
  0x15   : > { %p2104_p1 = pneg %p2445_p13  ;;  %p2117_p2 = scmp.lt.s32.totalorder %s2340_s12, 2 }
  0x16   : > { %s121_s28 = sand.u32 1, %s2336_s11   ;;  %s2229_s3 = scalar_lea.vmem %s111_s26, 16 }
  0x17   : > { %p2458_p7 = pnand %p2104_p1, %p3607_p4  ;;  %p2465_p3 = pnand %p2117_p2, %p2424_p5 }
  0x18   : > { %s1969_s30 = sshll.u32 %s121_s28, 7  ;;  %p2230_p8 = scmp.ne.s32.totalorder %s111_s26, %s2229_s3 }
  0x19   : > { %p2231_p9 = pneg %p2458_p7  ;;  %p2237_p12 = scmp.lt.s32.totalorder %s111_s26, %s111_s26 }
  0x1a   : > { %p2238_p11 = scmp.lt.s32.totalorder %s2229_s3, %s2229_s3 }
  0x1b   : > { %p2232_p10 = pnand %p2231_p9, %p2230_p8 }
  0x1c   : > { %p2239_p1 = por %p2238_p11, %p2237_p12 }
  0x1d   : > { %p2233_p0 = pneg %p2232_p10 }
  0x1f   : > { %p2240_p4 = pnand %p2239_p1, %p2233_p0 }
  0x21   : > { %2243 = shalt.err (!%p2240_p4)
}
  0x22   : > { %s2342_s4 = smov [#allocation7]   ;;  %s2093_s5 = sshll.u32 %s2340_s12, 11 }
  0x23   : > { %2107 = dma.vmem_to_smem (!%p2458_p7), %s111_s26, 16, %s2342_s4, [#allocation6]  }
  0x24   : > { %s125_s6 = scalar_lea.vmem [#allocation3], %s1969_s30  ;;  %s2477_s16 = scalar_lea.hbm %s3603_s0, %s2093_s5 }
  0x25   : > { %s133_s7 = sshll.u32 %s125_s6, 4  ;;  %s2481_s17 = scalar_lea.sflag [#allocation4], %s121_s28  ;;  %s2479_s7 = int_to_ptr.vmem [resolvable:$true] %s133_s7 }
  0x26   : > { %s2244_s19 = scalar_lea.hbm %s2477_s16, 2048  ;;  %p2246_p5 = pneg %p2465_p3 }
  0x27   : > { %p2245_p4 = scmp.ne.s32.totalorder %s2477_s16, %s2244_s19  ;;  %s2249_s26 = scalar_lea.hbm %s3603_s0, 4096 }
  0x28   : > { %p2250_p0 = scmp.lt.s32.totalorder %s2477_s16, %s3603_s0  ;;  %p2251_p2 = scmp.lt.s32.totalorder %s2249_s26, %s2244_s19 }
  0x29   : > { %p2247_p11 = pnand %p2246_p5, %p2245_p4 }
  0x2a   : > { %p2252_p7 = por %p2251_p2, %p2250_p0 }
  0x2b   : > { %p2248_p12 = pneg %p2247_p11 }
  0x2d   : > { %p2253_p8 = pnand %p2252_p7, %p2248_p12 }
  0x2f   : > { %2256 = shalt.err (!%p2253_p8)
}
  0x30   : > { %s2257_s28 = scalar_lea.vmem %s2479_s7, 2048  ;;  %s2343_s3 = smov [#allocation3]  }
  0x31   : > { %p2258_p9 = scmp.ne.s32.totalorder %s2479_s7, %s2257_s28  ;;  %s2262_s4 = sshll.u32 %s2343_s3, 4  ;;  %s2263_s4 = int_to_ptr.vmem [resolvable:$false] %s2262_s4 }
  0x32   : > { %s2264_s5 = scalar_lea.vmem %s2263_s4, 4096  ;;  %p2265_p4 = scmp.lt.s32.totalorder %s2479_s7, %s2263_s4 }
  0x33   : > { %p2260_p10 = pnand %p2258_p9, %p2246_p5  ;;  %p2266_p11 = scmp.lt.s32.totalorder %s2264_s5, %s2257_s28 }
  0x35   : > { %p2261_p1 = pneg %p2260_p10  ;;  %p2267_p6 = por %p2266_p11, %p2265_p4 }
  0x37   : > { %p2268_p13 = pnand %p2267_p6, %p2261_p1 }
  0x39   : > { %2271 = shalt.err (!%p2268_p13)
}
  0x3a   : > { %s2344_s6 = smov 256   ;;  %s2345_s8 = smov 16  }
  0x3b   : > { %2111 = dma.hbm_to_vmem [thread:$0]  (!%p2465_p3), %s2477_s16, 2048, %s2479_s7, %s2481_s17, %s2344_s6, %s2344_s6, %s2345_s8  }
  0x3c   : > { %p3641_p5 = scmp.ne.s32.totalorder %s3638_s23, 0 }
  0x3e   : > { %145 = sbr.rel (%p3641_p5) target bundleno = 803 (0x323), region = 28 }
  0x43   : > { %s2505_s14 = sand.u32 1, %s2332_s10   ;;  %p3642_p6 = scmp.ne.s32.totalorder %s3635_s20, 0 }
  0x44   : > { %s1974_s19 = sshll.u32 %s2505_s14, 7  ;;  %s148_s24 = scalar_lea.sflag [#allocation4], %s2505_s14 }
  0x45   : > { %s2509_s25 = scalar_lea.vmem [#allocation3], %s1974_s19 }
  0x46   : > { %2315 = dma.done.wait (%p3642_p6), %s148_s24, 2048  }
  0x47   : > { %2317 = vsyncadd (%p3642_p6), %s148_s24, 4294965248  ;;  %p3643_p13 = scmp.eq.s32.totalorder %s2406_s13, 0 }
  0x49   : > { %2319 = dma.done.wait (%p3643_p13), [#allocation6], 16   ;;  %p3644_p3 = pmov %p3643_p13 }
  0x4b   : > { %2321 = vsyncadd (%p3644_p3), [#allocation6], 4294967280 }
  0x4c   : > { %160 = sfence }
  0x4d   : > { %s2519_s23 = sld [smem:[#allocation7 + $0x7]]  ;;  %v3610_v0 = vlaneseq  ;;  %v180_v1 = vld [vmem:[%s2509_s25 + $0x8] sm:$0xff]  ;;  %v182_v2 = vld [vmem:[%s2509_s25 + $0x18] sm:$0xff]  ;;  %v2346_v3 = vmov 0.0   ;;  %s2347_s3 = smov 112   ;;  %vm319_vm1 = vcmask 1041409  }
  0x4e   : > { %307 = vst [vmem:[#allocation2 + $0x10] sm:$0xff] %v2346_v3  ;;  %s2524_s20 = sld [smem:[#allocation7 + $0x38]]  ;;  %308 = vst [vmem:[#allocation2] sm:$0xff] %v2346_v3  ;;  %v184_v4 = vld [vmem:[%s2509_s25 + $0x28] sm:$0xff]  ;;  %v186_v5 = vld [vmem:[%s2509_s25 + $0x38] sm:$0xff]  ;;  %v202_v7 = vadd.f32 %v182_v2, %v180_v1  ;;  %v258_v8 = vmax.f32 %v180_v1, %v182_v2  ;;  %s2348_s4 = smov 96  }
  0x4f   : > { %309 = vst [vmem:[#allocation2 + $0x18] sm:$0xff] %v2346_v3  ;;  %v188_v6 = vld [vmem:[%s2509_s25 + $0x48] sm:$0xff]  ;;  %v2532_v9 = vshrl.u32 %v3610_v0, 7  ;;  %s2534_s29 = sld [smem:[#allocation7 + $0xe]]  ;;  %v190_v10 = vld [vmem:[%s2509_s25 + $0x58] sm:$0xff]  ;;  %v216_v12 = vadd.f32 %v186_v5, %v184_v4  ;;  %v272_v13 = vmax.f32 %v184_v4, %v186_v5  ;;  %s2349_s5 = smov 80  }
  0x50   : > { %v2538_v11 = vld [vmem:[%s2509_s25 + $0x68] sm:$0xff]  ;;  %s2540_s7 = sld [smem:[#allocation7 + $0x3f]]  ;;  %v2543_v14 = vld [vmem:[%s2509_s25 + $0x78] sm:$0xff]  ;;  %v203_v15 = vrot.slane %v202_v7, 4  ;;  %v230_v16 = vadd.f32 %v190_v10, %v188_v6  ;;  %v259_v17 = vrot.slane %v258_v8, 4  ;;  %v2545_v18 = vmax.f32 %v188_v6, %v190_v10  ;;  %s2350_s6 = smov 64  }
  0x51   : > { %vm453_vm0 = vcmp.lt.s32.totalorder %v2532_v9, 4  ;;  %s2548_s16 = sld [smem:[#allocation7 + $0x15]]  ;;  %v217_v19 = vrot.slane %v216_v12, 4  ;;  %v244_v20 = vadd.f32 %v2543_v14, %v2538_v11  ;;  %v273_v21 = vrot.slane %v272_v13, 4  ;;  %s2351_s8 = smov 48  }
  0x52   : > { %s2552_s17 = sld [smem:[#allocation7 + $0x46]]  ;;  %v204_v22 = vadd.f32 %v203_v15, %v202_v7  ;;  %v231_v23 = vrot.slane %v230_v16, 4  ;;  %v260_v24 = vmax.f32 %v258_v8, %v259_v17  ;;  %v287_v25 = vrot.slane %v2545_v18, 4  ;;  %v181_v17 = vld [vmem:[%s2509_s25 + $0x10] sm:$0xff]  ;;  %p3716_p0 = scmp.ne.s32.totalorder %s3636_s21, 0 }
  0x53   : > { %v471_v26 = vstv %s2519_s23  ;;  %s2556_s26 = sld [smem:[#allocation7 + $0x1c]]  ;;  %v218_v27 = vadd.f32 %v217_v19, %v216_v12  ;;  %v245_v28 = vrot.slane %v244_v20, 4  ;;  %v274_v29 = vmax.f32 %v272_v13, %v273_v21 }
  0x54   : > { %v472_v30 = vstv %s2524_s20  ;;  %s2559_s27 = sld [smem:[#allocation7 + $0x4d]]  ;;  %v205_v31 = vrot.slane %v204_v22, 2  ;;  %v232_v32 = vadd.f32 %v231_v23, %v230_v16  ;;  %v261_v33 = vrot.slane %v260_v24, 2  ;;  %v179_v16 = vld [vmem:[%s2509_s25] sm:$0xff] }
  0x55   : > { %v2563_v34 = vsel %vm453_vm0, %v471_v26, %v472_v30  ;;  %v495_v35 = vstv %s2534_s29  ;;  %s2566_s30 = sld [smem:[#allocation7 + $0x23]]  ;;  %v219_v36 = vrot.slane %v218_v27, 2  ;;  %v246_v37 = vadd.f32 %v245_v28, %v244_v20  ;;  %v191_v26 = vld [vmem:[%s2509_s25 + $0x60] sm:$0xff]  ;;  %s2352_s29 = smov 32  }
  0x56   : > { %v474_v38 = vmul.f32 0.0, %v2563_v34  ;;  %v496_v39 = vstv %s2540_s7  ;;  %s2570_s28 = sld [smem:[#allocation7 + $0x54]]  ;;  %v206_v40 = vadd.f32 %v205_v31, %v204_v22  ;;  %v233_v41 = vrot.slane %v232_v32, 2  ;;  %v189_v22 = vld [vmem:[%s2509_s25 + $0x50] sm:$0xff] }
  0x57   : > { %v2574_v42 = vsel %vm453_vm0, %v495_v35, %v496_v39  ;;  %v519_v43 = vstv %s2548_s16  ;;  %v220_v44 = vadd.f32 %v219_v36, %v218_v27  ;;  %v247_v45 = vrot.slane %v246_v37, 2  ;;  %v193_v27 = vld [vmem:[%s2509_s25 + $0x70] sm:$0xff]  ;;  %s2060_s19 = sld [smem:[#allocation7 + $0x2a]] }
  0x58   : > { %480 = vrot.lane.b32.xlu0 %v474_v38, %s2347_s3  ;;  %v498_v46 = vmul.f32 0.0, %v2574_v42  ;;  %v520_v47 = vstv %s2552_s17  ;;  %v207_v48 = vrot.slane %v206_v40, 1  ;;  %v234_v49 = vadd.f32 %v233_v41, %v232_v32  ;;  %s2061_s24 = sld [smem:[#allocation7 + $0x5b]] }
  0x59   : > { %v2582_v50 = vsel %vm453_vm0, %v519_v43, %v520_v47  ;;  %v546_v51 = vstv %s2556_s26  ;;  %v221_v52 = vrot.slane %v220_v44, 1  ;;  %v248_v53 = vadd.f32 %v247_v45, %v246_v37  ;;  %s1993_s23 = sld [smem:[#allocation7 + $0x39]] }
  0x5a   : > { %504 = vrot.lane.b32.xlu1 %v498_v46, %s2348_s4  ;;  %v522_v54 = vmul.f32 0.0, %v2582_v50  ;;  %v547_v55 = vstv %s2559_s27  ;;  %v208_v56 = vadd.f32 %v207_v48, %v206_v40  ;;  %v235_v57 = vrot.slane %v234_v49, 1  ;;  %s2006_s20 = sld [smem:[#allocation7 + $0xf]]  ;;  %s2353_s27 = smov 77  }
  0x5b   : > { %v2590_v58 = vsel %vm453_vm0, %v546_v51, %v547_v55  ;;  %v570_v59 = vstv %s2566_s30  ;;  %v222_v60 = vadd.f32 %v221_v52, %v220_v44  ;;  %v249_v61 = vrot.slane %v248_v53, 1  ;;  %s2007_s7 = sld [smem:[#allocation7 + $0x40]] }
  0x5c   : > { %528 = vrot.lane.b32.xlu0 %v522_v54, %s2349_s5  ;;  %v551_v62 = vmul.f32 0.0, %v2590_v58  ;;  %v571_v63 = vstv %s2570_s28  ;;  %v236_v1 = vadd.f32 %v235_v57, %v234_v49  ;;  %v262_v2 = vmax.f32 %v260_v24, %v261_v33  ;;  %s2020_s16 = sld [smem:[#allocation7 + $0x16]] }
  0x5d   : > { %v2598_v4 = vsel %vm453_vm0, %v570_v59, %v571_v63  ;;  %v250_v5 = vadd.f32 %v249_v61, %v248_v53  ;;  %v275_v6 = vrot.slane %v274_v29, 2  ;;  %v288_v7 = vmax.f32 %v2545_v18, %v287_v25  ;;  %v183_v18 = vld [vmem:[%s2509_s25 + $0x20] sm:$0xff]  ;;  %s2021_s17 = sld [smem:[#allocation7 + $0x47]] }
  0x5e   : > { %559 = vrot.lane.b32.xlu1 %v551_v62, %s2350_s6  ;;  %v575_v8 = vmul.f32 0.0, %v2598_v4  ;;  %v263_v10 = vrot.slane %v262_v2, 1  ;;  %v300_v12 = vmax.f32 %v2538_v11, %v2543_v14  ;;  %vm321_vm2 = vcmask 1042434   ;;  %v185_v11 = vld [vmem:[%s2509_s25 + $0x30] sm:$0xff]  ;;  %v187_v14 = vld [vmem:[%s2509_s25 + $0x40] sm:$0xff]  ;;  %s1992_s25 = sld [smem:[#allocation7 + $0x8]] }
  0x5f   : > { %v276_v13 = vmax.f32 %v274_v29, %v275_v6  ;;  %v289_v15 = vrot.slane %v288_v7, 2  ;;  %vm323_vm3 = vcmask 1043459   ;;  %v325_v21 = vsel %vm319_vm1, %v222_v60, %v208_v56  ;;  %s2034_s26 = sld [smem:[#allocation7 + $0x1d]] }
  0x60   : > { %583 = vrot.lane.b32.xlu0 %v575_v8, %s2351_s8  ;;  %v264_v19 = vmax.f32 %v262_v2, %v263_v10  ;;  %v301_v20 = vrot.slane %v300_v12, 4  ;;  %vm340_vm4 = vcmask 1045509   ;;  %v326_v25 = vsel %vm321_vm2, %v236_v1, %v325_v21  ;;  %s2035_s30 = sld [smem:[#allocation7 + $0x4e]] }
  0x61   : > { %v277_v23 = vrot.slane %v276_v13, 1  ;;  %v290_v24 = vmax.f32 %v288_v7, %v289_v15  ;;  %vm342_vm5 = vcmask 1046534   ;;  %v327_v29 = vsel %vm323_vm3, %v250_v5, %v326_v25  ;;  %s2048_s28 = sld [smem:[#allocation7 + $0x24]] }
  0x62   : > { %v302_v28 = vmax.f32 %v300_v12, %v301_v20  ;;  %vm344_vm6 = vcmask 1047559   ;;  %v195_v30 = vadd.f32 %v181_v17, %v179_v16  ;;  %331 = vst [vmem:[#allocation2 + $0x18] sm:$0xf] %v327_v29  ;;  %v209_v33 = vadd.f32 %v185_v11, %v183_v18 }
  0x63   : > { %v278_v31 = vmax.f32 %v276_v13, %v277_v23  ;;  %v291_v32 = vrot.slane %v290_v24, 1  ;;  %v223_v35 = vadd.f32 %v189_v22, %v187_v14  ;;  %v237_v38 = vadd.f32 %v193_v27, %v191_v26 }
  0x64   : > { %v303_v36 = vrot.slane %v302_v28, 2  ;;  %v196_v37 = vrot.slane %v195_v30, 4  ;;  %v251_v39 = vmax.f32 %v179_v16, %v181_v17  ;;  %v210_v43 = vrot.slane %v209_v33, 4 }
  0x65   : > { %v292_v40 = vmax.f32 %v290_v24, %v291_v32  ;;  %v346_v41 = vsel %vm340_vm4, %v278_v31, %v264_v19  ;;  %v224_v44 = vrot.slane %v223_v35, 4  ;;  %v238_v47 = vrot.slane %v237_v38, 4 }
  0x66   : > { %v304_v45 = vmax.f32 %v302_v28, %v303_v36  ;;  %v197_v46 = vadd.f32 %v196_v37, %v195_v30  ;;  %v252_v48 = vrot.slane %v251_v39, 4  ;;  %v211_v51 = vadd.f32 %v210_v43, %v209_v33 }
  0x67   : > { %v347_v49 = vsel %vm342_vm5, %v292_v40, %v346_v41  ;;  %v225_v52 = vadd.f32 %v224_v44, %v223_v35  ;;  %v265_v53 = vmax.f32 %v183_v18, %v185_v11  ;;  %v239_v56 = vadd.f32 %v238_v47, %v237_v38 }
  0x68   : > { %v305_v54 = vrot.slane %v304_v45, 1  ;;  %v198_v55 = vrot.slane %v197_v46, 2  ;;  %v253_v57 = vmax.f32 %v251_v39, %v252_v48  ;;  %v212_v59 = vrot.slane %v211_v51, 2 }
  0x69   : > { %v226_v60 = vrot.slane %v225_v52, 2  ;;  %v266_v61 = vrot.slane %v265_v53, 4  ;;  %v279_v62 = vmax.f32 %v187_v14, %v189_v22  ;;  %v240_v2 = vrot.slane %v239_v56, 2 }
  0x6a   : > { %v306_v63 = vmax.f32 %v304_v45, %v305_v54  ;;  %v199_v1 = vadd.f32 %v198_v55, %v197_v46  ;;  %v254_v5 = vrot.slane %v253_v57, 2  ;;  %v213_v6 = vadd.f32 %v212_v59, %v211_v51 }
  0x6b   : > { %v227_v7 = vadd.f32 %v226_v60, %v225_v52  ;;  %v267_v8 = vmax.f32 %v265_v53, %v266_v61  ;;  %v280_v10 = vrot.slane %v279_v62, 4  ;;  %v241_v15 = vadd.f32 %v240_v2, %v239_v56 }
  0x6c   : > { %v348_v12 = vsel %vm344_vm6, %v306_v63, %v347_v49  ;;  %v200_v13 = vrot.slane %v199_v1, 1  ;;  %v255_v16 = vmax.f32 %v253_v57, %v254_v5  ;;  %v214_v17 = vrot.slane %v213_v6, 1 }
  0x6d   : > { %352 = vst [vmem:[#allocation2 + $0x18] sm:$0xf0] %v348_v12  ;;  %v228_v18 = vrot.slane %v227_v7, 1  ;;  %v268_v19 = vrot.slane %v267_v8, 2  ;;  %v281_v20 = vmax.f32 %v279_v62, %v280_v10  ;;  %v242_v11 = vrot.slane %v241_v15, 1 }
  0x6e   : > { %v201_v21 = vadd.f32 %v200_v13, %v199_v1  ;;  %v256_v14 = vrot.slane %v255_v16, 1  ;;  %v293_v22 = vmax.f32 %v191_v26, %v193_v27  ;;  %v215_v23 = vadd.f32 %v214_v17, %v213_v6 }
  0x6f   : > { %v229_v24 = vadd.f32 %v228_v18, %v227_v7  ;;  %v269_v25 = vmax.f32 %v267_v8, %v268_v19  ;;  %v282_v28 = vrot.slane %v281_v20, 2  ;;  %v243_v29 = vadd.f32 %v242_v11, %v241_v15 }
  0x70   : > { %v294_v30 = vrot.slane %v293_v22, 4  ;;  %v320_v33 = vsel %vm319_vm1, %v215_v23, %v201_v21  ;;  %v257_v35 = vmax.f32 %v255_v16, %v256_v14  ;;  %v594_v57 = vstv %s2060_s19  ;;  %s2049_s19 = sld [smem:[#allocation7 + $0x55]] }
  0x71   : > { %v270_v31 = vrot.slane %v269_v25, 1  ;;  %v283_v32 = vmax.f32 %v281_v20, %v282_v28  ;;  %v322_v37 = vsel %vm321_vm2, %v229_v24, %v320_v33  ;;  %v595_v59 = vstv %s2061_s24  ;;  %s1994_s24 = sld [smem:[#allocation7 + $0x9]] }
  0x72   : > { %v295_v36 = vmax.f32 %v293_v22, %v294_v30  ;;  %v324_v40 = vsel %vm323_vm3, %v243_v29, %v322_v37  ;;  %v455_v60 = vand.u32 127, %v3610_v0  ;;  %v596_v61 = vsel %vm453_vm0, %v594_v57, %v595_v59 }
  0x73   : > { %v271_v38 = vmax.f32 %v269_v25, %v270_v31  ;;  %v284_v39 = vrot.slane %v283_v32, 1  ;;  %330 = vst [vmem:[#allocation2] sm:$0xf] %v324_v40  ;;  %v654_v5 = vstv %s1992_s25  ;;  %v655_v6 = vstv %s1993_s23  ;;  %s1995_s25 = sld [smem:[#allocation7 + $0x3a]] }
  0x74   : > { %v2623_v41 = vld [vmem:[#allocation2 + $0x18] sm:$0xff]  ;;  %v296_v26 = vrot.slane %v295_v36, 2  ;;  %v456_v62 = vadd.s32 128, %v455_v60  ;;  %v2660_v2 = vand.u32 15, %v455_v60  ;;  %v656_v8 = vsel %vm453_vm0, %v654_v5, %v655_v6  ;;  %s2008_s23 = sld [smem:[#allocation7 + $0x10]] }
  0x75   : > { %v476_v27 = vmul.f32 %v2563_v34, %v2623_v41  ;;  %v285_v43 = vmax.f32 %v283_v32, %v284_v39  ;;  %v341_v45 = vsel %vm340_vm4, %v271_v38, %v257_v35  ;;  %v500_v46 = vmul.f32 %v2574_v42, %v2623_v41 }
  0x76   : > { %v297_v44 = vmax.f32 %v295_v36, %v296_v26  ;;  %v550_v63 = vmul.f32 %v2590_v58, %v2623_v41  ;;  %vm618_vm7 = vcmp.ge.s32.totalorder %v2660_v2, 3  ;;  %v598_v10 = vmul.f32 %v596_v61, %v2623_v41 }
  0x77   : > { %484 = vrot.lane.b32.xlu1 %v476_v27, %s2347_s3  ;;  %v343_v48 = vsel %vm342_vm5, %v285_v43, %v341_v45  ;;  %v2074_v12 = vsel %vm618_vm7, 1.0, %v2346_v3  ;;  %v659_v16 = vmul.f32 %v656_v8, %v2623_v41  ;;  %v677_v17 = vstv %s2006_s20  ;;  %s2009_s20 = sld [smem:[#allocation7 + $0x41]] }
  0x78   : > { %v298_v47 = vrot.slane %v297_v44, 1  ;;  %v678_v18 = vstv %s2007_s7  ;;  %v700_v19 = vstv %s2020_s16  ;;  %v701_v20 = vstv %s2021_s17  ;;  %s1996_s7 = sld [smem:[#allocation7 + $0xa]] }
  0x79   : > { %v679_v21 = vsel %vm453_vm0, %v677_v17, %v678_v18  ;;  %v702_v22 = vsel %vm453_vm0, %v700_v19, %v701_v20  ;;  %v723_v29 = vstv %s2034_s26  ;;  %v724_v30 = vstv %s2035_s30  ;;  %s1997_s16 = sld [smem:[#allocation7 + $0x3b]] }
  0x7a   : > { %v299_v49 = vmax.f32 %v297_v44, %v298_v47  ;;  %v680_v23 = vmul.f32 0.0, %v679_v21  ;;  %v703_v24 = vmul.f32 0.0, %v702_v22  ;;  %v682_v25 = vmul.f32 %v679_v21, %v2623_v41  ;;  %s2022_s17 = sld [smem:[#allocation7 + $0x17]] }
  0x7b   : > { %508 = vrot.lane.b32.xlu1 %v500_v46, %s2348_s4  ;;  %v705_v28 = vmul.f32 %v702_v22, %v2623_v41  ;;  %v746_v31 = vstv %s2048_s28  ;;  %v747_v32 = vstv %s2049_s19  ;;  %v725_v33 = vsel %vm453_vm0, %v723_v29, %v724_v30  ;;  %s2023_s26 = sld [smem:[#allocation7 + $0x48]] }
  0x7c   : > { %v345_v51 = vsel %vm344_vm6, %v299_v49, %v343_v48  ;;  %v727_v36 = vmul.f32 %v725_v33, %v2623_v41  ;;  %v748_v37 = vsel %vm453_vm0, %v746_v31, %v747_v32  ;;  %v728_v40 = vmul.f32 0.0, %v725_v33  ;;  %s2011_s30 = sld [smem:[#allocation7 + $0x42]] }
  0x7d   : > { %351 = vst [vmem:[#allocation2] sm:$0xf0] %v345_v51  ;;  %v751_v26 = vmul.f32 0.0, %v748_v37  ;;  %v843_v27 = vstv %s1994_s24  ;;  %v844_v43 = vstv %s1995_s25  ;;  %v866_v44 = vstv %s2008_s23  ;;  %s1998_s28 = sld [smem:[#allocation7 + $0xb]] }
  0x7e   : > { %v867_v45 = vstv %s2009_s20  ;;  %v845_v46 = vsel %vm453_vm0, %v843_v27, %v844_v43  ;;  %v750_v47 = vmul.f32 %v748_v37, %v2623_v41  ;;  %s1999_s19 = sld [smem:[#allocation7 + $0x3c]]  ;;  %vm792_vm9 = vcmp.ge.s32.totalorder %v2660_v2, 2 }
  0x7f   : > { %v868_v49 = vsel %vm453_vm0, %v866_v44, %v867_v45  ;;  %v846_v51 = vmul.f32 0.0, %v845_v46  ;;  %v1033_v57 = vstv %s1997_s16  ;;  %s2036_s24 = sld [smem:[#allocation7 + $0x1e]]  ;;  %vm981_vm11 = vcmp.ge.s32.totalorder %v2660_v2, 1 }
  0x80   : > { %v889_v59 = vstv %s2022_s17  ;;  %s2037_s25 = sld [smem:[#allocation7 + $0x4f]]  ;;  %vm510_vm13 = vcmask 785408   ;;  %vm1355_vm14 = vcmp.lt.s32.totalorder %v2660_v2, 15  ;;  %vm486_vm1 = vcmask 916480  }
  0x81   : > { %v890_v60 = vstv %s2023_s26  ;;  %s2024_s23 = sld [smem:[#allocation7 + $0x18]]  ;;  %vm1544_vm2 = vcmp.lt.s32.totalorder %v2660_v2, 14  ;;  %vm1733_vm4 = vcmp.lt.s32.totalorder %v2660_v2, 13  ;;  %vm534_vm6 = vcmask 654336  }
  0x82   : > { %s2025_s20 = sld [smem:[#allocation7 + $0x49]]  ;;  %vm561_vm7 = vcmask 523264  }
  0x83   : > { %s2013_s16 = sld [smem:[#allocation7 + $0x43]] }
  0x84   : > { %v2634_v52 = vld [vmem:[#allocation2] sm:$0xff]  ;;  %s2000_s17 = sld [smem:[#allocation7 + $0xc]] }
  0x85   : > { %v475_v53 = vmul.f32 %v2563_v34, %v2634_v52  ;;  %v523_v54 = vmul.f32 %v2582_v50, %v2634_v52  ;;  %v499_v55 = vmul.f32 %v2574_v42, %v2634_v52  ;;  %v549_v56 = vmul.f32 %v2590_v58, %v2634_v52  ;;  %s2001_s26 = sld [smem:[#allocation7 + $0x3d]] }
  0x86   : > { %v524_v34 = vmul.f32 %v2582_v50, %v2623_v41  ;;  %v574_v42 = vmul.f32 %v2598_v4, %v2623_v41  ;;  %v597_v1 = vmul.f32 %v596_v61, %v2634_v52  ;;  %v2662_v50 = vand.u32 15, %v456_v62 }
  0x87   : > { %482 = vrot.lane.b32.xlu0 %v475_v53, %s2347_s3  ;;  %530 = vrot.lane.b32.xlu1 %v523_v54, %s2349_s5  ;;  %v573_v7 = vmul.f32 %v2598_v4, %v2634_v52  ;;  %v599_v58 = vmul.f32 0.0, %v596_v61  ;;  %v657_v4 = vmul.f32 0.0, %v656_v8  ;;  %v658_v11 = vmul.f32 %v656_v8, %v2634_v52 }
  0x88   : > { %vm619_vm8 = vcmp.ge.s32.totalorder %v2662_v50, 3  ;;  %v681_v14 = vmul.f32 %v679_v21, %v2634_v52  ;;  %v704_v35 = vmul.f32 %v702_v22, %v2634_v52  ;;  %v726_v38 = vmul.f32 %v725_v33, %v2634_v52 }
  0x89   : > { %v2075_v13 = vsel %vm619_vm8, 1.0, %v2346_v3  ;;  %v749_v39 = vmul.f32 %v748_v37, %v2634_v52  ;;  %v847_v48 = vmul.f32 %v845_v46, %v2634_v52  ;;  %v869_v53 = vmul.f32 0.0, %v868_v49 }
  0x8a   : > { %v2178_v15 = vpack.i.bf16 %v2075_v13, %v2074_v12  ;;  %v848_v54 = vmul.f32 %v845_v46, %v2623_v41  ;;  %v891_v62 = vsel %vm453_vm0, %v889_v59, %v890_v60  ;;  %v1215_v8 = vstv %s1998_s28  ;;  %s2050_s28 = sld [smem:[#allocation7 + $0x25]] }
  0x8b   : > { %506 = vrot.lane.b32.xlu0 %v499_v55, %s2348_s4  ;;  %555 = vrot.lane.b32.xlu1 %v549_v56, %s2350_s6  ;;  %v871_v55 = vmul.f32 %v868_v49, %v2623_v41  ;;  %v1032_v56 = vstv %s1996_s7  ;;  %v894_v6 = vmul.f32 %v891_v62, %v2623_v41  ;;  %v893_v12 = vmul.f32 %v891_v62, %v2634_v52  ;;  %s2012_s7 = sld [smem:[#allocation7 + $0x12]] }
  0x8c   : > { %v912_v20 = vstv %s2036_s24  ;;  %v913_v21 = vstv %s2037_s25  ;;  %v1239_v29 = vstv %s2013_s16  ;;  %s2038_s24 = sld [smem:[#allocation7 + $0x1f]]  ;;  %vm793_vm10 = vcmp.ge.s32.totalorder %v2662_v50, 2 }
  0x8d   : > { %v914_v22 = vsel %vm453_vm0, %v912_v20, %v913_v21  ;;  %s2039_s25 = sld [smem:[#allocation7 + $0x50]]  ;;  %vm982_vm12 = vcmp.ge.s32.totalorder %v2662_v50, 1  ;;  %vm1356_vm15 = vcmp.lt.s32.totalorder %v2662_v50, 15  ;;  %vm1545_vm3 = vcmp.lt.s32.totalorder %v2662_v50, 14 }
  0x8e   : > { %v915_v30 = vmul.f32 %v914_v22, %v2634_v52  ;;  %s2015_s16 = sld [smem:[#allocation7 + $0x44]]  ;;  %vm1734_vm5 = vcmp.lt.s32.totalorder %v2662_v50, 13  ;;  %vm585_vm8 = vcmask 392192  }
  0x8f   : > { %532 = vrot.lane.b32.xlu0 %v524_v34, %s2349_s5  ;;  %581 = vrot.lane.b32.xlu1 %v574_v42, %s2351_s8  ;;  %v1034_v34 = vsel %vm453_vm0, %v1032_v56, %v1033_v57  ;;  %v870_v42 = vmul.f32 %v868_v49, %v2634_v52 }
  0x90   : > { %v1036_v61 = vmul.f32 %v1034_v34, %v2634_v52  ;;  %v1037_v5 = vmul.f32 %v1034_v34, %v2623_v41  ;;  %v935_v60 = vstv %s2050_s28  ;;  %s2847_s28 = sld [smem:[#allocation7 + $0x26]] }
  0x93   : > { %557 = vrot.lane.b32.xlu0 %v550_v63, %s2350_s6  ;;  %603 = vrot.lane.b32.xlu1 %v597_v1, %s2352_s29  ;;  %v1035_v63 = vmul.f32 0.0, %v1034_v34  ;;  %v892_v1 = vmul.f32 0.0, %v891_v62 }
  0x94   : > { %v1428_v20 = vstv %s2015_s16  ;;  %s2017_s16 = sld [smem:[#allocation7 + $0x45]] }
  0x97   : > { %579 = vrot.lane.b32.xlu0 %v573_v7, %s2351_s8  ;;  %607 = vrot.lane.b32.xlu1 %v599_v58, %s2352_s29  ;;  %v1056_v58 = vstv %s2011_s30  ;;  %s2063_s30 = sld [smem:[#allocation7 + $0x5c]] }
  0x9b   : > { %605 = vrot.lane.b32.xlu0 %v598_v10, %s2352_s29  ;;  %663 = vrot.lane.b32.xlu1 %v657_v4, %s2347_s3  ;;  %v1216_v10 = vstv %s1999_s19  ;;  %s2051_s19 = sld [smem:[#allocation7 + $0x56]] }
  0x9d   : > { %v770_v44 = vstv %s2063_s30  ;;  %s2065_s30 = sld [smem:[#allocation7 + $0x5d]] }
  0x9f   : > { %2179 = vrot.lane.b32.xlu0 %v2178_v15, %s2353_s27  ;;  %667 = vrot.lane.b32.xlu1 %v659_v16, %s2347_s3  ;;  %s2010_s27 = sld [smem:[#allocation7 + $0x11]]  ;;  %v1217_v15 = vsel %vm453_vm0, %v1215_v8, %v1216_v10 }
  0xa0   : > { %v1218_v17 = vmul.f32 0.0, %v1217_v15  ;;  %v1220_v19 = vmul.f32 %v1217_v15, %v2623_v41 }
  0xa1   : > { %v936_v34 = vstv %s2051_s19  ;;  %s2053_s19 = sld [smem:[#allocation7 + $0x57]] }
  0xa2   : > { %v937_v62 = vsel %vm453_vm0, %v935_v60, %v936_v34  ;;  %v1119_v34 = vstv %s2847_s28  ;;  %s2042_s28 = sld [smem:[#allocation7 + $0x21]] }
  0xa3   : > { %665 = vrot.lane.b32.xlu0 %v658_v11, %s2347_s3  ;;  %688 = vrot.lane.b32.xlu1 %v681_v14, %s2348_s4  ;;  %v1078_v11 = vstv %s2024_s23  ;;  %v1079_v14 = vstv %s2025_s20  ;;  %s2026_s23 = sld [smem:[#allocation7 + $0x19]] }
  0xa4   : > { %s2027_s20 = sld [smem:[#allocation7 + $0x4a]] }
  0xa5   : > { %v1055_v7 = vstv %s2010_s27  ;;  %s2062_s27 = sld [smem:[#allocation7 + $0x2b]] }
  0xa6   : > { %v1057_v4 = vsel %vm453_vm0, %v1055_v7, %v1056_v58  ;;  %v938_v58 = vmul.f32 %v937_v62, %v2634_v52 }
  0xa7   : > { %686 = vrot.lane.b32.xlu0 %v680_v23, %s2348_s4  ;;  %709 = vrot.lane.b32.xlu1 %v703_v24, %s2349_s5  ;;  %v1059_v13 = vmul.f32 %v1057_v4, %v2634_v52  ;;  %v1058_v16 = vmul.f32 0.0, %v1057_v4  ;;  %v1060_v18 = vmul.f32 %v1057_v4, %v2623_v41  ;;  %v1219_v23 = vmul.f32 %v1217_v15, %v2634_v52 }
  0xa8   : > { %v916_v24 = vmul.f32 %v914_v22, %v2623_v41 }
  0xa9   : > { %v1261_v15 = vstv %s2026_s23  ;;  %s2041_s23 = sld [smem:[#allocation7 + $0x51]] }
  0xab   : > { %690 = vrot.lane.b32.xlu0 %v682_v25, %s2348_s4  ;;  %713 = vrot.lane.b32.xlu1 %v705_v28, %s2349_s5  ;;  %v1080_v25 = vsel %vm453_vm0, %v1078_v11, %v1079_v14  ;;  %v1238_v28 = vstv %s2012_s7  ;;  %v769_v43 = vstv %s2062_s27  ;;  %s2014_s7 = sld [smem:[#allocation7 + $0x13]] }
  0xac   : > { %v1081_v31 = vmul.f32 %v1080_v25, %v2634_v52  ;;  %v1240_v32 = vsel %vm453_vm0, %v1238_v28, %v1239_v29  ;;  %v1082_v37 = vmul.f32 %v1080_v25, %v2623_v41  ;;  %s2842_s27 = sld [smem:[#allocation7 + $0x2c]] }
  0xad   : > { %v1242_v46 = vmul.f32 %v1240_v32, %v2634_v52 }
  0xaf   : > { %711 = vrot.lane.b32.xlu0 %v704_v35, %s2349_s5  ;;  %734 = vrot.lane.b32.xlu1 %v727_v36, %s2350_s6  ;;  %v917_v35 = vmul.f32 0.0, %v914_v22  ;;  %v1241_v36 = vmul.f32 0.0, %v1240_v32 }
  0xb3   : > { %732 = vrot.lane.b32.xlu0 %v726_v38, %s2350_s6  ;;  %755 = vrot.lane.b32.xlu1 %v749_v39, %s2351_s8  ;;  %v1243_v39 = vmul.f32 %v1240_v32, %v2623_v41 }
  0xb7   : > { %736 = vrot.lane.b32.xlu0 %v728_v40, %s2350_s6  ;;  %759 = vrot.lane.b32.xlu1 %v751_v26, %s2351_s8  ;;  %v1404_v40 = vstv %s2000_s17  ;;  %v1405_v26 = vstv %s2001_s26  ;;  %s2002_s17 = sld [smem:[#allocation7 + $0xd]] }
  0xb8   : > { %v1406_v45 = vsel %vm453_vm0, %v1404_v40, %v1405_v26  ;;  %s2003_s26 = sld [smem:[#allocation7 + $0x3e]] }
  0xb9   : > { %v1409_v56 = vmul.f32 %v1406_v45, %v2623_v41 }
  0xbb   : > { %757 = vrot.lane.b32.xlu0 %v750_v47, %s2351_s8  ;;  %854 = vrot.lane.b32.xlu1 %v847_v48, %s2347_s3  ;;  %v1408_v47 = vmul.f32 %v1406_v45, %v2634_v52  ;;  %v771_v48 = vsel %vm453_vm0, %v769_v43, %v770_v44  ;;  %v2076_v44 = vsel %vm792_vm9, 1.0, %v2346_v3  ;;  %vm609_vm9 = vcmask 261120  }
  0xbc   : > { %v774_v59 = vmul.f32 0.0, %v771_v48 }
  0xbf   : > { %852 = vrot.lane.b32.xlu0 %v846_v51, %s2347_s3  ;;  %875 = vrot.lane.b32.xlu1 %v869_v53, %s2348_s4  ;;  %v1407_v53 = vmul.f32 0.0, %v1406_v45  ;;  %v2077_v45 = vsel %vm793_vm10, 1.0, %v2346_v3  ;;  %vm808_vm10 = vcmask 637952  }
  0xc3   : > { %856 = vrot.lane.b32.xlu0 %v848_v54, %s2347_s3  ;;  %879 = vrot.lane.b32.xlu1 %v871_v55, %s2348_s4  ;;  %v772_v54 = vmul.f32 %v771_v48, %v2634_v52 }
  0xc7   : > { %877 = vrot.lane.b32.xlu0 %v870_v42, %s2348_s4  ;;  %1043 = vrot.lane.b32.xlu1 %v1036_v61, %s2347_s3  ;;  %v1096_v42 = vstv %s2038_s24  ;;  %v1097_v61 = vstv %s2039_s25  ;;  %s2040_s24 = sld [smem:[#allocation7 + $0x20]]  ;;  %s2354_s25 = smov 78  }
  0xca   : > { %v2769_v38 = vpop.permute.xlu0 %480 }
  0xcb   : > { %1041 = vrot.lane.b32.xlu0 %v1035_v63, %s2347_s3  ;;  %898 = vrot.lane.b32.xlu1 %v892_v1, %s2349_s5  ;;  %3646 = vst [vmem:[#allocation13_spill] sm:$0xff] %v2769_v38  ;;  %v773_v63 = vmul.f32 %v771_v48, %v2623_v41  ;;  %v939_v1 = vmul.f32 %v937_v62, %v2623_v41 }
  0xcc   : > { %v2763_v33 = vpop.permute.xlu1 %504 }
  0xcd   : > { %3645 = vst [vmem:[#allocation12_spill] sm:$0xff] %v2763_v33 }
  0xce   : > { %v2783_v49 = vpop.permute.xlu0 %528 }
  0xcf   : > { %1045 = vrot.lane.b32.xlu0 %v1037_v5, %s2347_s3  ;;  %902 = vrot.lane.b32.xlu1 %v894_v6, %s2349_s5  ;;  %3648 = vst [vmem:[#allocation15_spill] sm:$0xff] %v2783_v49  ;;  %v1098_v5 = vsel %vm453_vm0, %v1096_v42, %v1097_v61  ;;  %v1120_v42 = vstv %s2053_s19  ;;  %s2355_s19 = smov 79  }
  0xd0   : > { %v2773_v27 = vpop.permute.xlu1 %559  ;;  %v1099_v8 = vmul.f32 %v1098_v5, %v2634_v52  ;;  %v1100_v11 = vmul.f32 %v1098_v5, %v2623_v41 }
  0xd1   : > { %3647 = vst [vmem:[#allocation14_spill] sm:$0xff] %v2773_v27 }
  0xd2   : > { %v2791_v55 = vpop.permute.xlu0 %583 }
  0xd3   : > { %900 = vrot.lane.b32.xlu0 %v893_v12, %s2349_s5  ;;  %1066 = vrot.lane.b32.xlu1 %v1059_v13, %s2348_s4  ;;  %3650 = vst [vmem:[#allocation17_spill] sm:$0xff] %v2791_v55  ;;  %v940_v12 = vmul.f32 0.0, %v937_v62  ;;  %v1101_v13 = vmul.f32 0.0, %v1098_v5  ;;  %v2356_v55 = vmov 1.0|1.0  }
  0xd7   : > { %1064 = vrot.lane.b32.xlu0 %v1058_v16, %s2348_s4  ;;  %1224 = vrot.lane.b32.xlu1 %v1218_v17, %s2347_s3  ;;  %v1262_v16 = vstv %s2027_s20  ;;  %s2028_s20 = sld [smem:[#allocation7 + $0x1a]] }
  0xd8   : > { %v1263_v21 = vsel %vm453_vm0, %v1261_v15, %v1262_v16  ;;  %v2895_v15 = vld [vmem:[#allocation2 + $0x10] sm:$0xff] }
  0xd9   : > { %v1265_v14 = vmul.f32 %v1263_v21, %v2623_v41  ;;  %v1264_v25 = vmul.f32 %v1263_v21, %v2634_v52 }
  0xdb   : > { %1068 = vrot.lane.b32.xlu0 %v1060_v18, %s2348_s4  ;;  %1228 = vrot.lane.b32.xlu1 %v1220_v19, %s2347_s3  ;;  %v1427_v19 = vstv %s2014_s7  ;;  %s2029_s7 = sld [smem:[#allocation7 + $0x4b]] }
  0xdc   : > { %v1429_v22 = vsel %vm453_vm0, %v1427_v19, %v1428_v20  ;;  %v1284_v20 = vstv %s2040_s24  ;;  %s2043_s24 = sld [smem:[#allocation7 + $0x52]] }
  0xdd   : > { %v1430_v28 = vmul.f32 0.0, %v1429_v22  ;;  %v1432_v32 = vmul.f32 %v1429_v22, %v2623_v41  ;;  %v1431_v26 = vmul.f32 %v1429_v22, %v2634_v52  ;;  %v1450_v22 = vstv %s2028_s20  ;;  %s2069_s20 = sld [smem:[#allocation7 + $0x5f]] }
  0xdf   : > { %1226 = vrot.lane.b32.xlu0 %v1219_v23, %s2347_s3  ;;  %923 = vrot.lane.b32.xlu1 %v916_v24, %s2350_s6 }
  0xe3   : > { %921 = vrot.lane.b32.xlu0 %v915_v30, %s2350_s6  ;;  %1085 = vrot.lane.b32.xlu1 %v1081_v31, %s2349_s5  ;;  %v1266_v31 = vmul.f32 0.0, %v1263_v21  ;;  %v1285_v21 = vstv %s2041_s23  ;;  %s2031_s23 = sld [smem:[#allocation7 + $0x4c]] }
  0xe7   : > { %925 = vrot.lane.b32.xlu0 %v917_v35, %s2350_s6  ;;  %1247 = vrot.lane.b32.xlu1 %v1241_v36, %s2348_s4  ;;  %v1593_v35 = vstv %s2002_s17  ;;  %v1594_v36 = vstv %s2003_s26  ;;  %s2924_s17 = sld [smem:[#allocation7 + $0x2d]] }
  0xe8   : > { %v1595_v40 = vsel %vm453_vm0, %v1593_v35, %v1594_v36  ;;  %s2067_s26 = sld [smem:[#allocation7 + $0x5e]] }
  0xe9   : > { %v2785_v51 = vpop.permute.xlu1 %484  ;;  %v1597_v43 = vmul.f32 %v1595_v40, %v2634_v52  ;;  %v1596_v48 = vmul.f32 0.0, %v1595_v40  ;;  %v1598_v61 = vmul.f32 %v1595_v40, %v2623_v41 }
  0xea   : > { %3649 = vst [vmem:[#allocation16_spill] sm:$0xff] %v2785_v51 }
  0xeb   : > { %1087 = vrot.lane.b32.xlu0 %v1082_v37, %s2349_s5  ;;  %1251 = vrot.lane.b32.xlu1 %v1243_v39, %s2348_s4 }
  0xed   : > { %v2795_v57 = vpop.permute.xlu1 %508 }
  0xee   : > { %3651 = vst [vmem:[#allocation18_spill] sm:$0xff] %v2795_v57 }
  0xef   : > { %1249 = vrot.lane.b32.xlu0 %v1242_v46, %s2348_s4  ;;  %1415 = vrot.lane.b32.xlu1 %v1408_v47, %s2347_s3 }
  0xf3   : > { %1413 = vrot.lane.b32.xlu0 %v1407_v53, %s2347_s3  ;;  %778 = vrot.lane.b32.xlu1 %v772_v54, %s2352_s29  ;;  %v2183_v53 = vpack.i.bf16 %v2077_v45, %v2076_v44  ;;  %v958_v54 = vstv %s2842_s27  ;;  %s2930_s27 = sld [smem:[#allocation7 + $0x27]] }
  0xf7   : > { %1417 = vrot.lane.b32.xlu0 %v1409_v56, %s2347_s3  ;;  %782 = vrot.lane.b32.xlu1 %v774_v59, %s2352_s29  ;;  %v959_v56 = vstv %s2065_s30  ;;  %s2055_s30 = sld [smem:[#allocation7 + $0x58]] }
  0xf8   : > { %v960_v3 = vsel %vm453_vm0, %v958_v54, %v959_v56  ;;  %v1617_v56 = vstv %s2017_s16  ;;  %s2044_s16 = sld [smem:[#allocation7 + $0x22]] }
  0xf9   : > { %v2805_v6 = vpop.permute.xlu0 %482  ;;  %v2807_v7 = vpop.permute.xlu1 %530  ;;  %v962_v62 = vmul.f32 %v960_v3, %v2623_v41  ;;  %v963_v16 = vmul.f32 %v2895_v15, %v960_v3 }
  0xfa   : > { %3652 = vst [vmem:[#allocation19_spill] sm:$0xff] %v2805_v6  ;;  %3653 = vst [vmem:[#allocation20_spill] sm:$0xff] %v2807_v7  ;;  %v3114_v7 = vld [vmem:[#allocation2 + $0x18] sm:$0xff]  ;;  %v3136_v6 = vld [vmem:[#allocation2] sm:$0xff] }
  0xfb   : > { %780 = vrot.lane.b32.xlu0 %v773_v63, %s2352_s29  ;;  %946 = vrot.lane.b32.xlu1 %v939_v1, %s2351_s8  ;;  %v1121_v63 = vsel %vm453_vm0, %v1119_v34, %v1120_v42 }
  0xfc   : > { %v1124_v19 = vmul.f32 %v2895_v15, %v1121_v63 }
  0xfd   : > { %v2813_v10 = vpop.permute.xlu0 %506  ;;  %v2815_v4 = vpop.permute.xlu1 %555 }
  0xfe   : > { %3654 = vst [vmem:[#allocation21_spill] sm:$0xff] %v2813_v10  ;;  %3655 = vst [vmem:[#allocation22_spill] sm:$0xff] %v2815_v4 }
  0xff   : > { %944 = vrot.lane.b32.xlu0 %v938_v58, %s2351_s8  ;;  %1105 = vrot.lane.b32.xlu1 %v1099_v8, %s2350_s6  ;;  %v961_v58 = vmul.f32 %v960_v3, %v2634_v52  ;;  %v1122_v8 = vmul.f32 %v1121_v63, %v2634_v52 }
 0x101   : > { %v2819_v17 = vpop.permute.xlu0 %532  ;;  %v2821_v18 = vpop.permute.xlu1 %581 }
 0x102   : > { %3656 = vst [vmem:[#allocation23_spill] sm:$0xff] %v2819_v17  ;;  %3657 = vst [vmem:[#allocation24_spill] sm:$0xff] %v2821_v18 }
 0x103   : > { %948 = vrot.lane.b32.xlu0 %v940_v12, %s2351_s8  ;;  %1109 = vrot.lane.b32.xlu1 %v1101_v13, %s2350_s6 }
 0x105   : > { %v2831_v23 = vpop.permute.xlu0 %557  ;;  %v2833_v24 = vpop.permute.xlu1 %603 }
 0x106   : > { %3658 = vst [vmem:[#allocation25_spill] sm:$0xff] %v2831_v23  ;;  %3659 = vst [vmem:[#allocation26_spill] sm:$0xff] %v2833_v24 }
 0x107   : > { %1107 = vrot.lane.b32.xlu0 %v1100_v11, %s2350_s6  ;;  %1272 = vrot.lane.b32.xlu1 %v1265_v14, %s2349_s5 }
 0x109   : > { %v2838_v29 = vpop.permute.xlu0 %579  ;;  %v2840_v30 = vpop.permute.xlu1 %607 }
 0x10a   : > { %3660 = vst [vmem:[#allocation27_spill] sm:$0xff] %v2838_v29  ;;  %3661 = vst [vmem:[#allocation28_spill] sm:$0xff] %v2840_v30 }
 0x10b   : > { %1270 = vrot.lane.b32.xlu0 %v1264_v25, %s2349_s5  ;;  %1436 = vrot.lane.b32.xlu1 %v1430_v28, %s2348_s4  ;;  %v1451_v25 = vstv %s2029_s7  ;;  %v1286_v28 = vsel %vm453_vm0, %v1284_v20, %v1285_v21  ;;  %v1142_v21 = vstv %s2924_s17  ;;  %s2056_s7 = sld [smem:[#allocation7 + $0x28]] }
 0x10c   : > { %v1452_v35 = vsel %vm453_vm0, %v1450_v22, %v1451_v25  ;;  %v1143_v22 = vstv %s2067_s26  ;;  %s2045_s17 = sld [smem:[#allocation7 + $0x53]] }
 0x10d   : > { %v2849_v37 = vpop.permute.xlu0 %605  ;;  %v2851_v39 = vpop.permute.xlu1 %663  ;;  %s2070_s26 = sld [smem:[#allocation7 + $0x2f]] }
 0x10e   : > { %3662 = vst [vmem:[#allocation29_spill] sm:$0xff] %v2849_v37 }
 0x10f   : > { %1274 = vrot.lane.b32.xlu0 %v1266_v31, %s2349_s5  ;;  %1440 = vrot.lane.b32.xlu1 %v1432_v32, %s2348_s4  ;;  %v1123_v31 = vmul.f32 %v1121_v63, %v2623_v41  ;;  %v1288_v32 = vmul.f32 %v1286_v28, %v2623_v41  ;;  %v2078_v63 = vsel %vm981_vm11, 1.0, %v2895_v15  ;;  %vm997_vm11 = vcmask 646144  }
 0x111   : > { %v2863_v46 = vpop.permute.xlu0 %2179  ;;  %v2865_v47 = vpop.permute.xlu1 %667 }
 0x112   : > { %3663 = vst [vmem:[#allocation30_spill] sm:$0xff] %v2863_v46  ;;  %v1663_v29 = vstv %s2045_s17  ;;  %s2358_s17 = smov 82  }
 0x113   : > { %1438 = vrot.lane.b32.xlu0 %v1431_v26, %s2348_s4  ;;  %1604 = vrot.lane.b32.xlu1 %v1597_v43, %s2347_s3  ;;  %v1287_v26 = vmul.f32 %v1286_v28, %v2634_v52  ;;  %v1453_v43 = vmul.f32 %v1452_v35, %v2634_v52 }
 0x115   : > { %v2870_v59 = vpop.permute.xlu0 %665  ;;  %v2872_v60 = vpop.permute.xlu1 %688 }
 0x117   : > { %1602 = vrot.lane.b32.xlu0 %v1596_v48, %s2347_s3  ;;  %2184 = vrot.lane.b32.xlu1 %v2183_v53, %s2354_s25  ;;  %v1289_v48 = vmul.f32 %v2895_v15, %v1286_v28  ;;  %v1455_v53 = vmul.f32 %v2895_v15, %v1452_v35  ;;  %s2030_s25 = sld [smem:[#allocation7 + $0x1b]] }
 0x119   : > { %v2882_v1 = vpop.permute.xlu0 %686  ;;  %v2884_v5 = vpop.permute.xlu1 %709 }
 0x11b   : > { %1606 = vrot.lane.b32.xlu0 %v1598_v61, %s2347_s3  ;;  %969 = vrot.lane.b32.xlu1 %v962_v62, %s2352_s29  ;;  %s2016_s3 = sld [smem:[#allocation7 + $0x14]]  ;;  %v1454_v61 = vmul.f32 %v1452_v35, %v2623_v41  ;;  %v1144_v35 = vsel %vm453_vm0, %v1142_v21, %v1143_v22 }
 0x11d   : > { %v2890_v12 = vpop.permute.xlu0 %690  ;;  %v2892_v13 = vpop.permute.xlu1 %713 }
 0x11f   : > { %967 = vrot.lane.b32.xlu0 %v961_v58, %s2352_s29  ;;  %1128 = vrot.lane.b32.xlu1 %v1122_v8, %s2351_s8  ;;  %v2079_v58 = vsel %vm982_vm12, 1.0, %v2895_v15  ;;  %vm1369_vm12 = vcmask 662528  }
 0x120   : > { %v2188_v20 = vpack.i.bf16 %v2079_v58, %v2078_v63  ;;  %v1147_v63 = vmul.f32 %v2895_v15, %v1144_v35 }
 0x121   : > { %v2900_v11 = vpop.permute.xlu0 %711  ;;  %v2902_v14 = vpop.permute.xlu1 %734  ;;  %v1616_v54 = vstv %s2016_s3  ;;  %s2057_s3 = sld [smem:[#allocation7 + $0x59]] }
 0x122   : > { %v1618_v3 = vsel %vm453_vm0, %v1616_v54, %v1617_v56  ;;  %v1145_v56 = vmul.f32 %v1144_v35, %v2634_v52 }
 0x123   : > { %971 = vrot.lane.b32.xlu0 %v963_v16, %s2352_s29  ;;  %1132 = vrot.lane.b32.xlu1 %v1124_v19, %s2351_s8  ;;  %v1620_v62 = vmul.f32 %v1618_v3, %v2634_v52  ;;  %v1619_v19 = vmul.f32 %v2895_v15, %v1618_v3 }
 0x125   : > { %v2912_v36 = vpop.permute.xlu0 %732  ;;  %v2914_v40 = vpop.permute.xlu1 %755 }
 0x127   : > { %1130 = vrot.lane.b32.xlu0 %v1123_v31, %s2351_s8  ;;  %1295 = vrot.lane.b32.xlu1 %v1288_v32, %s2350_s6  ;;  %v1307_v31 = vstv %s2930_s27  ;;  %v1308_v32 = vstv %s2055_s30  ;;  %s2071_s27 = sld [smem:[#allocation7 + $0x60]] }
 0x128   : > { %v1497_v30 = vstv %s2057_s3  ;;  %s3055_s30 = sld [smem:[#allocation7 + $0x5a]] }
 0x129   : > { %v2920_v44 = vpop.permute.xlu0 %736  ;;  %v2922_v45 = vpop.permute.xlu1 %759  ;;  %s3121_s3 = sld [smem:[#allocation7 + $0x5]] }
 0x12b   : > { %1293 = vrot.lane.b32.xlu0 %v1287_v26, %s2350_s6  ;;  %1459 = vrot.lane.b32.xlu1 %v1453_v43, %s2349_s5  ;;  %v1621_v26 = vmul.f32 %v1618_v3, %v2623_v41  ;;  %v1146_v43 = vmul.f32 %v1144_v35, %v2623_v41 }
 0x12d   : > { %v2932_v34 = vpop.permute.xlu0 %757  ;;  %v2934_v42 = vpop.permute.xlu1 %854 }
 0x12f   : > { %1297 = vrot.lane.b32.xlu0 %v1289_v48, %s2350_s6  ;;  %1463 = vrot.lane.b32.xlu1 %v1455_v53, %s2349_s5  ;;  %v1309_v48 = vsel %vm453_vm0, %v1307_v31, %v1308_v32  ;;  %v1639_v31 = vstv %s2030_s25  ;;  %v1640_v32 = vstv %s2031_s23  ;;  %s3080_s25 = sld [smem:[#allocation7 + $0x35]] }
 0x130   : > { %v1310_v3 = vmul.f32 %v1309_v48, %v2634_v52  ;;  %v1312_v58 = vmul.f32 %v2895_v15, %v1309_v48  ;;  %v1311_v35 = vmul.f32 %v1309_v48, %v2623_v41  ;;  %s3087_s23 = sld [smem:[#allocation7 + $0x30]] }
 0x131   : > { %v2946_v8 = vpop.permute.xlu0 %852  ;;  %v2948_v16 = vpop.permute.xlu1 %875 }
 0x132   : > { %3664 = vst [vmem:[#allocation31_spill] sm:$0xff] %v2948_v16 }
 0x133   : > { %1461 = vrot.lane.b32.xlu0 %v1454_v61, %s2349_s5  ;;  %1627 = vrot.lane.b32.xlu1 %v1620_v62, %s2348_s4 }
 0x135   : > { %v2954_v25 = vpop.permute.xlu0 %856  ;;  %v2956_v28 = vpop.permute.xlu1 %879  ;;  %v1207_v38 = vstv %s3080_s25  ;;  %s2363_s25 = smov 124  }
 0x136   : > { %3665 = vst [vmem:[#allocation32_spill] sm:$0xff] %v2956_v28 }
 0x137   : > { %1625 = vrot.lane.b32.xlu0 %v1619_v19, %s2348_s4  ;;  %2189 = vrot.lane.b32.xlu1 %v2188_v20, %s2355_s19  ;;  %v1473_v19 = vstv %s2042_s28  ;;  %v1474_v20 = vstv %s2043_s24  ;;  %s3061_s28 = sld [smem:[#allocation7 + $0x3]] }
 0x138   : > { %s3070_s19 = sld [smem:[#allocation7 + $0x34]] }
 0x139   : > { %v2966_v53 = vpop.permute.xlu0 %877  ;;  %v2968_v54 = vpop.permute.xlu1 %1043  ;;  %s3076_s24 = sld [smem:[#allocation7 + $0x4]] }
 0x13a   : > { %3666 = vst [vmem:[#allocation33_spill] sm:$0xff] %v2968_v54 }
 0x13b   : > { %1629 = vrot.lane.b32.xlu0 %v1621_v26, %s2348_s4  ;;  %1153 = vrot.lane.b32.xlu1 %v1146_v43, %s2352_s29  ;;  %s2068_s4 = sld [smem:[#allocation7 + $0x2e]]  ;;  %v1475_v26 = vsel %vm453_vm0, %v1473_v19, %v1474_v20  ;;  %v1331_v20 = vstv %s2069_s20 }
 0x13c   : > { %v1477_v43 = vmul.f32 %v1475_v26, %v2623_v41  ;;  %v1476_v24 = vmul.f32 %v1475_v26, %v2634_v52  ;;  %s3096_s20 = sld [smem:[#allocation7 + $0x1]] }
 0x13d   : > { %v2974_v61 = vpop.permute.xlu0 %1041  ;;  %v2976_v62 = vpop.permute.xlu1 %898 }
 0x13e   : > { %3667 = vst [vmem:[#allocation34_spill] sm:$0xff] %v2974_v61  ;;  %3668 = vst [vmem:[#allocation35_spill] sm:$0xff] %v2976_v62 }
 0x13f   : > { %1151 = vrot.lane.b32.xlu0 %v1145_v56, %s2352_s29  ;;  %1316 = vrot.lane.b32.xlu1 %v1310_v3, %s2351_s8  ;;  %v1641_v56 = vsel %vm453_vm0, %v1639_v31, %v1640_v32  ;;  %v1478_v31 = vmul.f32 %v2895_v15, %v1475_v26 }
 0x140   : > { %v1644_v32 = vmul.f32 %v2895_v15, %v1641_v56 }
 0x141   : > { %v2982_v21 = vpop.permute.xlu0 %1045  ;;  %v2984_v22 = vpop.permute.xlu1 %902  ;;  %v1330_v19 = vstv %s2068_s4  ;;  %s3094_s4 = sld [smem:[#allocation7 + $0x61]] }
 0x142   : > { %3669 = vst [vmem:[#allocation36_spill] sm:$0xff] %v2984_v22  ;;  %v1048_v2 = vsel %vm486_vm1, %v2968_v54, %v2982_v21 }
 0x143   : > { %1155 = vrot.lane.b32.xlu0 %v1147_v63, %s2352_s29  ;;  %1320 = vrot.lane.b32.xlu1 %v1312_v58, %s2351_s8  ;;  %v1642_v63 = vmul.f32 %v1641_v56, %v2634_v52 }
 0x145   : > { %v2994_v3 = vpop.permute.xlu0 %900  ;;  %v2996_v0 = vpop.permute.xlu1 %1066 }
 0x146   : > { %3670 = vst [vmem:[#allocation37_spill] sm:$0xff] %v2994_v3  ;;  %3671 = vst [vmem:[#allocation38_spill] sm:$0xff] %v2996_v0 }
 0x147   : > { %1318 = vrot.lane.b32.xlu0 %v1311_v35, %s2351_s8  ;;  %1484 = vrot.lane.b32.xlu1 %v1477_v43, %s2350_s6  ;;  %v1332_v35 = vsel %vm453_vm0, %v1330_v19, %v1331_v20  ;;  %v1496_v20 = vstv %s2056_s7  ;;  %s3098_s7 = sld [smem:[#allocation7 + $0x32]] }
 0x148   : > { %v1333_v26 = vmul.f32 %v1332_v35, %v2634_v52  ;;  %v1335_v19 = vmul.f32 %v2895_v15, %v1332_v35  ;;  %v1498_v18 = vsel %vm453_vm0, %v1496_v20, %v1497_v30  ;;  %v1520_v20 = vstv %s2071_s27  ;;  %s1981_s27 = sld [smem:[#allocation7 + $0x33]] }
 0x149   : > { %v3002_v48 = vpop.permute.xlu0 %1064  ;;  %v3004_v58 = vpop.permute.xlu1 %1224  ;;  %v1499_v17 = vmul.f32 %v1498_v18, %v2634_v52 }
 0x14a   : > { %3672 = vst [vmem:[#allocation39_spill] sm:$0xff] %v3002_v48 }
 0x14b   : > { %1482 = vrot.lane.b32.xlu0 %v1476_v24, %s2350_s6  ;;  %1648 = vrot.lane.b32.xlu1 %v1642_v63, %s2349_s5  ;;  %v1643_v24 = vmul.f32 %v1641_v56, %v2623_v41 }
 0x14d   : > { %v3012_v43 = vpop.permute.xlu0 %1068  ;;  %v3014_v46 = vpop.permute.xlu1 %1228 }
 0x14f   : > { %1486 = vrot.lane.b32.xlu0 %v1478_v31, %s2350_s6  ;;  %1652 = vrot.lane.b32.xlu1 %v1644_v32, %s2349_s5  ;;  %v1662_v32 = vstv %s2044_s16  ;;  %s3133_s16 = sld [smem:[#allocation7 + $0x36]] }
 0x150   : > { %v1664_v4 = vsel %vm453_vm0, %v1662_v32, %v1663_v29  ;;  %v1501_v29 = vmul.f32 %v2895_v15, %v1498_v18 }
 0x151   : > { %v3020_v63 = vpop.permute.xlu0 %1226  ;;  %v3022_v37 = vpop.permute.xlu1 %923  ;;  %v1667_v32 = vmul.f32 %v2895_v15, %v1664_v4 }
 0x152   : > { %3673 = vst [vmem:[#allocation40_spill] sm:$0xff] %v3022_v37 }
 0x153   : > { %1650 = vrot.lane.b32.xlu0 %v1643_v24, %s2349_s5  ;;  %1339 = vrot.lane.b32.xlu1 %v1333_v26, %s2352_s29  ;;  %v1334_v24 = vmul.f32 %v1332_v35, %v2623_v41  ;;  %v1500_v26 = vmul.f32 %v1498_v18, %v2623_v41 }
 0x155   : > { %v3027_v31 = vpop.permute.xlu0 %921  ;;  %v3029_v56 = vpop.permute.xlu1 %1085 }
 0x156   : > { %3674 = vst [vmem:[#allocation41_spill] sm:$0xff] %v3027_v31  ;;  %v1709_v31 = vstv %s3094_s4  ;;  %s2365_s4 = smov 122  }
 0x157   : > { %2194 = vrot.lane.b32.xlu0 %v2356_v55, %s2349_s5  ;;  %1343 = vrot.lane.b32.xlu1 %v1335_v19, %s2352_s29  ;;  %v1665_v55 = vmul.f32 %v1664_v4, %v2634_v52  ;;  %v1519_v19 = vstv %s2070_s26  ;;  %s3049_s5 = sld [smem:[#allocation7 + $0x29]] }
 0x158   : > { %s1980_s26 = sld [smem:[#allocation7 + $0x2]] }
 0x159   : > { %v3039_v23 = vpop.permute.xlu0 %925  ;;  %v1248_v27 = vpop.permute.xlu1 %1247 }
 0x15a   : > { %3675 = vst [vmem:[#allocation42_spill] sm:$0xff] %v3039_v23  ;;  %v1708_v23 = vstv %s3087_s23  ;;  %s2364_s23 = smov 123  }
 0x15b   : > { %1341 = vrot.lane.b32.xlu0 %v1334_v24, %s2352_s29  ;;  %1507 = vrot.lane.b32.xlu1 %v1500_v26, %s2351_s8  ;;  %v1521_v24 = vsel %vm453_vm0, %v1519_v19, %v1520_v20  ;;  %v2081_v20 = vsel %vm1356_vm15, 1.0, %v2895_v15  ;;  %v1710_v50 = vsel %vm453_vm0, %v1708_v23, %v1709_v31  ;;  %v1071_v23 = vsel %vm510_vm13, %v2996_v0, %v3012_v43 }
 0x15c   : > { %v1522_v19 = vmul.f32 %v1521_v24, %v2634_v52  ;;  %v1523_v33 = vmul.f32 %v3114_v7, %v1521_v24  ;;  %vm1747_vm15 = vcmask 678912  }
 0x15d   : > { %v3045_v30 = vpop.permute.xlu0 %1087  ;;  %v3047_v35 = vpop.permute.xlu1 %1251 }
 0x15e   : > { %v1089_v3 = vsel %vm534_vm6, %v3029_v56, %v3045_v30 }
 0x15f   : > { %1505 = vrot.lane.b32.xlu0 %v1499_v17, %s2351_s8  ;;  %1671 = vrot.lane.b32.xlu1 %v1665_v55, %s2350_s6  ;;  %v1666_v55 = vmul.f32 %v1664_v4, %v2623_v41  ;;  %v1524_v4 = vmul.f32 %v2895_v15, %v1521_v24 }
 0x161   : > { %v1250_v26 = vpop.permute.xlu0 %1249  ;;  %v1416_v57 = vpop.permute.xlu1 %1415 }
 0x162   : > { %v3064_v17 = vsel %vm510_vm13, %v1248_v27, %v1250_v26  ;;  %v3068_v18 = vsel %vm510_vm13, %v1250_v26, %v3047_v35  ;;  %v2080_v27 = vsel %vm1355_vm14, 1.0, %v2895_v15  ;;  %vm1558_vm14 = vcmask 670720  }
 0x163   : > { %1509 = vrot.lane.b32.xlu0 %v1501_v29, %s2351_s8  ;;  %1675 = vrot.lane.b32.xlu1 %v1667_v32, %s2350_s6  ;;  %v2198_v52 = vpack.i.bf16 %v2081_v20, %v2080_v27  ;;  %v1685_v29 = vstv %s3049_s5  ;;  %v1686_v32 = vstv %s3055_s30  ;;  %s2360_s5 = smov 127   ;;  %s3293_s30 = sld [smem:[#allocation7 + $0x6]] }
 0x164   : > { %v1023_v27 = vstv %s3061_s28  ;;  %v1024_v20 = vstv %s3070_s19  ;;  %s1989_s28 = sld [smem:[#allocation7 + $0x37]]  ;;  %s2361_s19 = smov 126  }
 0x165   : > { %v1414_v26 = vpop.permute.xlu0 %1413  ;;  %v3082_v51 = vpop.permute.xlu1 %778  ;;  %v3129_v24 = vsel %vm453_vm0, %v1023_v27, %v1024_v20  ;;  %v646_v27 = vstv %s3098_s7  ;;  %s1977_s7 = sld [smem:[#allocation7 + $0x31]] }
 0x166   : > { %v3085_v41 = vsel %vm486_vm1, %v1414_v26, %v1416_v57  ;;  %3677 = vst [vmem:[#allocation44_spill] sm:$0xff] %v3129_v24  ;;  %v1027_v20 = vmul.f32 %v3136_v6, %v3129_v24 }
 0x167   : > { %1673 = vrot.lane.b32.xlu0 %v1666_v55, %s2350_s6  ;;  %1528 = vrot.lane.b32.xlu1 %v1522_v19, %s2352_s29  ;;  %v1687_v19 = vsel %vm453_vm0, %v1685_v29, %v1686_v32  ;;  %s2357_s6 = smov 81   ;;  %v2083_v29 = vsel %vm1545_vm3, 1.0, %v2895_v15  ;;  %vm1386_vm3 = vcmask 1014784  }
 0x168   : > { %v1689_v10 = vmul.f32 %v3114_v7, %v1687_v19  ;;  %v1688_v48 = vmul.f32 %v3136_v6, %v1687_v19  ;;  %v1053_v31 = vadd.f32 %v1048_v2, %v1027_v20  ;;  %v1231_v2 = vsel %vm486_vm1, %v3020_v63, %v3014_v46 }
 0x169   : > { %v3100_v26 = vpop.permute.xlu0 %1417  ;;  %v3102_v49 = vpop.permute.xlu1 %782 }
 0x16a   : > { %v3108_v55 = vsel %vm486_vm1, %v1416_v57, %v3100_v26  ;;  %v2082_v57 = vsel %vm1544_vm2, 1.0, %v2895_v15  ;;  %v1076_v0 = vadd.f32 %v1071_v23, %v1053_v31  ;;  %vm1197_vm2 = vcmask 1022976  }
 0x16b   : > { %2199 = vrot.lane.b32.xlu0 %v2198_v52, %s2357_s6  ;;  %1532 = vrot.lane.b32.xlu1 %v1524_v4, %s2352_s29  ;;  %v1206_v4 = vstv %s3076_s24  ;;  %v2203_v61 = vpack.i.bf16 %v2083_v29, %v2082_v57  ;;  %v1690_v57 = vmul.f32 %v2895_v15, %v1687_v19  ;;  %v2084_v29 = vsel %vm1733_vm4, 1.0, %v2895_v15  ;;  %s2362_s24 = smov 125   ;;  %s2367_s6 = smov 51  }
 0x16c   : > { %v1208_v37 = vsel %vm453_vm0, %v1206_v4, %v1207_v38  ;;  %v1712_v38 = vmul.f32 %v3114_v7, %v1710_v50  ;;  %v2085_v4 = vsel %vm1734_vm5, 1.0, %v2895_v15  ;;  %vm1575_vm4 = vcmask 1006592  }
 0x16d   : > { %v3123_v32 = vpop.permute.xlu0 %780  ;;  %v3125_v52 = vpop.permute.xlu1 %946  ;;  %v2208_v28 = vpack.i.bf16 %v2085_v4, %v2084_v29  ;;  %v1094_v29 = vadd.f32 %v1089_v3, %v1076_v0  ;;  %vm1764_vm5 = vcmask 998400  }
 0x16e   : > { %3676 = vst [vmem:[#allocation43_spill] sm:$0xff] %v3125_v52  ;;  %v645_v52 = vstv %s3096_s20  ;;  %s353_s20 = sld [smem:[#allocation7]] }
 0x16f   : > { %1530 = vrot.lane.b32.xlu0 %v1523_v33, %s2352_s29  ;;  %1696 = vrot.lane.b32.xlu1 %v1689_v10, %s2351_s8  ;;  %v1028_v33 = vmul.f32 %v3114_v7, %v3129_v24  ;;  %v647_v54 = vsel %vm453_vm0, %v645_v52, %v646_v27  ;;  %v1395_v24 = vstv %s3121_s3  ;;  %v1396_v52 = vstv %s3133_s16  ;;  %s1976_s3 = sshll.u32 %s2505_s14, 3 }
 0x170   : > { %v1711_v27 = vmul.f32 %v3136_v6, %v1710_v50  ;;  %v648_v20 = vmul.f32 %v2895_v15, %v647_v54  ;;  %v1397_v4 = vsel %vm453_vm0, %v1395_v24, %v1396_v52  ;;  %s176_s16 = scalar_lea.vmem [#allocation8], %s1976_s3 }
 0x171   : > { %v3152_v22 = vpop.permute.xlu0 %944  ;;  %v3154_v10 = vpop.permute.xlu1 %1105  ;;  %v1054_v19 = vadd.f32 %v2982_v21, %v1028_v33  ;;  %v1230_v21 = vsel %vm486_vm1, %v3004_v58, %v3020_v63  ;;  %v1211_v33 = vmul.f32 %v3114_v7, %v1208_v37  ;;  %v1400_v24 = vmul.f32 %v3114_v7, %v1397_v4 }
 0x172   : > { %3678 = vst [vmem:[#allocation45_spill] sm:$0xff] %v3152_v22 }
 0x173   : > { %1694 = vrot.lane.b32.xlu0 %v1688_v48, %s2351_s8  ;;  %2204 = vrot.lane.b32.xlu1 %v2203_v61, %s2358_s17  ;;  %v1209_v48 = vmul.f32 %v2895_v15, %v1208_v37  ;;  %v1210_v61 = vmul.f32 %v3136_v6, %v1208_v37  ;;  %v1077_v16 = vadd.f32 %v3012_v43, %v1054_v19  ;;  %s1880_s17 = sshll.u32 %s176_s16, 4  ;;  %s3547_s17 = int_to_ptr.vmem [resolvable:$true] %s1880_s17 }
 0x175   : > { %v3175_v22 = vpop.permute.xlu0 %948  ;;  %v1110_v62 = vpop.permute.xlu1 %1109  ;;  %v1095_v43 = vadd.f32 %v3045_v30, %v1077_v16  ;;  %v1235_v31 = vadd.f32 %v1230_v21, %v1209_v48  ;;  %v1236_v0 = vadd.f32 %v1231_v2, %v1210_v61  ;;  %v692_v30 = vsel %vm510_vm13, %v2882_v1, %v2872_v60 }
 0x176   : > { %v650_v48 = vmul.f32 %v3114_v7, %v647_v54  ;;  %v715_v1 = vsel %vm534_vm6, %v2884_v5, %v2900_v11  ;;  %v1426_v2 = vadd.f32 %v3100_v26, %v1400_v24 }
 0x177   : > { %1698 = vrot.lane.b32.xlu0 %v1690_v57, %s2351_s8  ;;  %1719 = vrot.lane.b32.xlu1 %v1712_v38, %s2352_s29  ;;  %v1713_v57 = vmul.f32 %v2895_v15, %v1710_v50  ;;  %v669_v38 = vsel %vm486_vm1, %v2851_v39, %v2870_v59  ;;  %s2359_s8 = smov 83   ;;  %v1258_v39 = vadd.f32 %v3064_v17, %v1235_v31 }
 0x178   : > { %v674_v50 = vadd.f32 %v669_v38, %v648_v20  ;;  %v1259_v19 = vadd.f32 %v3068_v18, %v1236_v0  ;;  %v1237_v20 = vadd.f32 %v3014_v46, %v1211_v33  ;;  %v693_v18 = vsel %vm510_vm13, %v2872_v60, %v2890_v12 }
 0x179   : > { %v1108_v58 = vpop.permute.xlu0 %1107  ;;  %v1273_v23 = vpop.permute.xlu1 %1272  ;;  %v676_v33 = vadd.f32 %v2865_v47, %v650_v48 }
 0x17a   : > { %v1111_v37 = vsel %vm561_vm7, %v3154_v10, %v1108_v58  ;;  %v1112_v63 = vsel %vm561_vm7, %v1108_v58, %v1110_v62  ;;  %v649_v62 = vmul.f32 %v3136_v6, %v647_v54  ;;  %v697_v21 = vadd.f32 %v692_v30, %v674_v50 }
 0x17b   : > { %v3203_v3 = vadd.f32 %v1111_v37, %v1094_v29  ;;  %1717 = vrot.lane.b32.xlu0 %v1711_v27, %s2352_s29  ;;  %v3206_v16 = vadd.f32 %v1112_v63, %v1095_v43  ;;  %2209 = vrot.lane.b32.xlu1 %v2208_v28, %s2359_s8  ;;  %v670_v28 = vsel %vm486_vm1, %v2870_v59, %v2865_v47  ;;  %s2095_s8 = sshll.u32 %s2406_s13, 7 }
 0x17c   : > { %v1398_v59 = vmul.f32 %v2895_v15, %v1397_v4  ;;  %v675_v5 = vadd.f32 %v670_v28, %v649_v62  ;;  %v720_v29 = vadd.f32 %v715_v1, %v697_v21  ;;  %v1260_v43 = vadd.f32 %v3047_v35, %v1237_v20  ;;  %s3552_s13 = scalar_lea.hbm %s3605_s2, %s2095_s8 }
 0x17d   : > { %v1271_v61 = vpop.permute.xlu0 %1270  ;;  %v1437_v52 = vpop.permute.xlu1 %1436  ;;  %v1399_v58 = vmul.f32 %v3136_v6, %v1397_v4  ;;  %v699_v35 = vadd.f32 %v2890_v12, %v676_v33  ;;  %v738_v4 = vsel %vm561_vm7, %v2912_v36, %v2902_v14  ;;  %v761_v12 = vsel %vm585_vm8, %v2914_v40, %v2932_v34 }
 0x17e   : > { %v3222_v17 = vadd.f32 %v1271_v61, %v1258_v39  ;;  %v1276_v27 = vsel %vm534_vm6, %v1271_v61, %v1273_v23  ;;  %v698_v37 = vadd.f32 %v693_v18, %v675_v5  ;;  %v743_v63 = vadd.f32 %v2912_v36, %v720_v29 }
 0x17f   : > { %1721 = vrot.lane.b32.xlu0 %v1713_v57, %s2352_s29  ;;  %v3227_v54 = vadd.f32 %v1276_v27, %v1259_v19  ;;  %v716_v57 = vsel %vm534_vm6, %v2900_v11, %v2892_v13  ;;  %v1424_v11 = vadd.f32 %v3085_v41, %v1398_v59  ;;  %v739_v39 = vsel %vm561_vm7, %v2902_v14, %v2920_v44 }
 0x180   : > { %v721_v47 = vadd.f32 %v716_v57, %v698_v37  ;;  %v722_v36 = vadd.f32 %v2892_v13, %v699_v35  ;;  %v784_v14 = vsel %vm609_vm9, %v3082_v51, %v3123_v32  ;;  %v762_v61 = vsel %vm585_vm8, %v2932_v34, %v2922_v45 }
 0x181   : > { %v1275_v38 = vpop.permute.xlu0 %1274  ;;  %v1441_v46 = vpop.permute.xlu1 %1440  ;;  %v785_v20 = vsel %vm609_vm9, %v3123_v32, %v3102_v49  ;;  %v835_v33 = vstv %s1981_s27 }
 0x182   : > { %v1277_v60 = vsel %vm534_vm6, %v1273_v23, %v1275_v38  ;;  %v3241_v31 = vadd.f32 %v1441_v46, %v1426_v2  ;;  %v1425_v23 = vadd.f32 %v3108_v55, %v1399_v58  ;;  %v744_v62 = vadd.f32 %v738_v4, %v721_v47 }
 0x183   : > { %v3243_v26 = vadd.f32 %v1277_v60, %v1260_v43  ;;  %v766_v55 = vadd.f32 %v2914_v40, %v743_v63  ;;  %v745_v44 = vadd.f32 %v739_v39, %v722_v36  ;;  %v858_v4 = vsel %vm486_vm1, %v2946_v8, %v2934_v42  ;;  %v3680_v36 = vld [vmem:[#allocation32_spill] sm:$0xff] }
 0x184   : > { %v767_v19 = vadd.f32 %v761_v12, %v744_v62  ;;  %v3679_v12 = vld [vmem:[#allocation31_spill] sm:$0xff]  ;;  %v882_v62 = vsel %vm510_vm13, %v2966_v53, %v3680_v36 }
 0x185   : > { %v1439_v0 = vpop.permute.xlu0 %1438  ;;  %v1605_v30 = vpop.permute.xlu1 %1604  ;;  %v789_v13 = vadd.f32 %v3082_v51, %v766_v55  ;;  %v768_v18 = vadd.f32 %v762_v61, %v745_v44  ;;  %v881_v8 = vsel %vm510_vm13, %v3679_v12, %v2966_v53  ;;  %v3682_v44 = vld [vmem:[#allocation35_spill] sm:$0xff] }
 0x186   : > { %v1442_v24 = vsel %vm510_vm13, %v1437_v52, %v1439_v0  ;;  %v1443_v50 = vsel %vm510_vm13, %v1439_v0, %v1441_v46  ;;  %v790_v21 = vadd.f32 %v784_v14, %v767_v19  ;;  %v834_v46 = vstv %s1980_s26  ;;  %v3681_v14 = vld [vmem:[#allocation37_spill] sm:$0xff] }
 0x187   : > { %v1447_v41 = vadd.f32 %v1442_v24, %v1424_v11  ;;  %v3261_v48 = vadd.f32 %v1443_v50, %v1425_v23  ;;  %v791_v51 = vadd.f32 %v785_v20, %v768_v18  ;;  %v836_v57 = vsel %vm453_vm0, %v834_v46, %v835_v33  ;;  %v3684_v20 = vld [vmem:[#allocation40_spill] sm:$0xff]  ;;  %v3685_v18 = vld [vmem:[#allocation41_spill] sm:$0xff] }
 0x188   : > { %v837_v35 = vmul.f32 %v2895_v15, %v836_v57  ;;  %v838_v47 = vmul.f32 %v3136_v6, %v836_v57  ;;  %v839_v63 = vmul.f32 %v3114_v7, %v836_v57  ;;  %v859_v0 = vsel %vm486_vm1, %v2934_v42, %v2954_v25  ;;  %v3686_v57 = vld [vmem:[#allocation43_spill] sm:$0xff] }
 0x189   : > { %v1603_v52 = vpop.permute.xlu0 %1602  ;;  %v2185_v28 = vpop.permute.xlu1 %2184  ;;  %v1584_v19 = vstv %s3293_s30  ;;  %s2272_s30 = scalar_lea.vmem %s3547_s17, 128 }
 0x18a   : > { %v3272_v1 = vsel %vm486_vm1, %v1603_v52, %v1605_v30  ;;  %v2187_v27 = vunpack.i.h.bf16 %v2185_v28  ;;  %v2186_v40 = vunpack.i.l.bf16 %v2185_v28  ;;  %v863_v50 = vadd.f32 %v858_v4, %v837_v35  ;;  %p2273_p12 = scmp.ne.s32.totalorder %s3547_s17, %s2272_s30 }
 0x18b   : > { %v864_v55 = vadd.f32 %v859_v0, %v838_v47  ;;  %v865_v42 = vadd.f32 %v2954_v25, %v839_v63  ;;  %v3688_v63 = vld [vmem:[#allocation42_spill] sm:$0xff] }
 0x18c   : > { %v809_v59 = vsel %vm808_vm10, %v2186_v40, %v2187_v27  ;;  %v813_v2 = vmul.f32 %v2186_v40, %v789_v13  ;;  %v815_v43 = vmul.f32 %v2187_v27, %v791_v51  ;;  %v886_v28 = vadd.f32 %v881_v8, %v863_v50  ;;  %v3683_v13 = vld [vmem:[#allocation36_spill] sm:$0xff]  ;;  %p2274_p2 = pnand %p2273_p12, %p3716_p0 }
 0x18d   : > { %v3277_v45 = vpop.permute.xlu0 %1606  ;;  %v814_v34 = vmul.f32 %v809_v59, %v790_v21  ;;  %v3279_v5 = vpop.permute.xlu1 %969  ;;  %v1585_v27 = vstv %s1989_s28  ;;  %v887_v21 = vadd.f32 %v882_v62, %v864_v55  ;;  %v927_v59 = vsel %vm561_vm7, %v3685_v18, %v3684_v20  ;;  %s2368_s28 = smov [#allocation8]  }
 0x18e   : > { %v3283_v29 = vsel %vm486_vm1, %v1605_v30, %v3277_v45  ;;  %819 = vrot.lane.b32.xlu0 %v813_v2, %s2360_s5  ;;  %v888_v2 = vadd.f32 %v3680_v36, %v865_v42  ;;  %v3339_v51 = vsel %vm453_vm0, %v1584_v19, %v1585_v27  ;;  %v928_v0 = vsel %vm561_vm7, %v3684_v20, %v3688_v63  ;;  %p2275_p7 = pneg %p2274_p2 }
 0x18f   : > { %821 = vrot.lane.b32.xlu1 %v814_v34, %s2360_s5  ;;  %v951_v62 = vsel %vm585_vm8, %v3686_v57, %v3175_v22  ;;  %v1588_v55 = vmul.f32 %v3136_v6, %v3339_v51 }
 0x190   : > { %v911_v8 = vadd.f32 %v3683_v13, %v888_v2 }
 0x191   : > { %v968_v49 = vpop.permute.xlu0 %967  ;;  %v3285_v32 = vpop.permute.xlu1 %1128  ;;  %v1614_v22 = vadd.f32 %v3283_v29, %v1588_v55 }
 0x192   : > { %823 = vrot.lane.b32.xlu0 %v815_v43, %s2360_s5  ;;  %v934_v42 = vadd.f32 %v928_v0, %v911_v8  ;;  %s1866_s5 = scalar_lea.sflag [#allocation5], %s2505_s14 }
 0x195   : > { %v3287_v58 = vpop.permute.xlu0 %971  ;;  %v3289_v38 = vpop.permute.xlu1 %1132 }
 0x199   : > { %v3295_v60 = vpop.permute.xlu0 %1130  ;;  %v1296_v37 = vpop.permute.xlu1 %1295 }
 0x19d   : > { %v3303_v11 = vpop.permute.xlu0 %1293  ;;  %v1460_v23 = vpop.permute.xlu1 %1459 }
 0x19e   : > { %v1299_v30 = vsel %vm561_vm7, %v3303_v11, %v1296_v37  ;;  %v3310_v39 = vadd.f32 %v1460_v23, %v1447_v41  ;;  %v904_v41 = vsel %vm534_vm6, %v3682_v44, %v3681_v14 }
 0x19f   : > { %v3316_v24 = vadd.f32 %v1299_v30, %v3227_v54  ;;  %v905_v54 = vsel %vm534_vm6, %v3681_v14, %v3683_v13  ;;  %v909_v25 = vadd.f32 %v904_v41, %v886_v28 }
 0x1a0   : > { %v910_v34 = vadd.f32 %v905_v54, %v887_v21 }
 0x1a1   : > { %v1298_v61 = vpop.permute.xlu0 %1297  ;;  %v1464_v52 = vpop.permute.xlu1 %1463  ;;  %v932_v33 = vadd.f32 %v3685_v18, %v909_v25 }
 0x1a2   : > { %v1300_v40 = vsel %vm561_vm7, %v1296_v37, %v1298_v61  ;;  %v933_v47 = vadd.f32 %v927_v59, %v910_v34  ;;  %v974_v61 = vsel %vm609_vm9, %v3279_v5, %v3287_v58  ;;  %v3689_v34 = vld [vmem:[#allocation44_spill] sm:$0xff] }
 0x1a3   : > { %v3331_v53 = vadd.f32 %v1300_v40, %v3243_v26  ;;  %v3687_v26 = vld [vmem:[#allocation45_spill] sm:$0xff] }
 0x1a4   : > { %v950_v37 = vsel %vm585_vm8, %v3687_v26, %v3686_v57  ;;  %v955_v50 = vadd.f32 %v3687_v26, %v932_v33  ;;  %v3690_v33 = vld [vmem:[#allocation33_spill] sm:$0xff]  ;;  %v3691_v57 = vld [vmem:[#allocation34_spill] sm:$0xff] }
 0x1a5   : > { %v1462_v43 = vpop.permute.xlu0 %1461  ;;  %v3341_v46 = vpop.permute.xlu1 %1627  ;;  %v956_v36 = vadd.f32 %v950_v37, %v933_v47  ;;  %v1047_v26 = vsel %vm486_vm1, %v3691_v57, %v3690_v33  ;;  %v3693_v47 = vld [vmem:[#allocation39_spill] sm:$0xff] }
 0x1a6   : > { %v1465_v35 = vsel %vm534_vm6, %v1460_v23, %v1462_v43  ;;  %v1466_v4 = vsel %vm534_vm6, %v1462_v43, %v1464_v52  ;;  %v973_v23 = vsel %vm609_vm9, %v968_v49, %v3279_v5  ;;  %v978_v14 = vadd.f32 %v968_v49, %v955_v50 }
 0x1a7   : > { %v3353_v30 = vadd.f32 %v1465_v35, %v3261_v48  ;;  %v3356_v12 = vadd.f32 %v1466_v4, %v3241_v31  ;;  %v979_v19 = vadd.f32 %v973_v23, %v956_v36  ;;  %v957_v52 = vadd.f32 %v951_v62, %v934_v42  ;;  %v3692_v4 = vld [vmem:[#allocation38_spill] sm:$0xff] }
 0x1a8   : > { %v1026_v43 = vmul.f32 %v2895_v15, %v3689_v34  ;;  %v1070_v63 = vsel %vm510_vm13, %v3693_v47, %v3692_v4  ;;  %v1134_v42 = vsel %vm585_vm8, %v3285_v32, %v3295_v60 }
 0x1a9   : > { %v3367_v48 = vpop.permute.xlu0 %1625  ;;  %v2190_v31 = vpop.permute.xlu1 %2189  ;;  %v980_v21 = vadd.f32 %v974_v61, %v957_v52 }
 0x1aa   : > { %v2192_v44 = vunpack.i.h.bf16 %v2190_v31  ;;  %v2191_v41 = vunpack.i.l.bf16 %v2190_v31  ;;  %v1052_v0 = vadd.f32 %v1047_v26, %v1026_v43 }
 0x1ac   : > { %v998_v28 = vsel %vm997_vm11, %v2191_v41, %v2192_v44  ;;  %v1002_v13 = vmul.f32 %v2191_v41, %v978_v14  ;;  %v1004_v5 = vmul.f32 %v2192_v44, %v980_v21  ;;  %v1075_v23 = vadd.f32 %v1070_v63, %v1052_v0 }
 0x1ad   : > { %v3373_v54 = vpop.permute.xlu0 %1629  ;;  %v1003_v27 = vmul.f32 %v998_v28, %v979_v19  ;;  %v1154_v40 = vpop.permute.xlu1 %1153  ;;  %v1140_v41 = vadd.f32 %v1134_v42, %v3203_v3  ;;  %v1135_v19 = vsel %vm585_vm8, %v3295_v60, %v3289_v38 }
 0x1ae   : > { %v1632_v49 = vsel %vm510_vm13, %v3341_v46, %v3373_v54  ;;  %1008 = vrot.lane.b32.xlu1 %v1002_v13, %s2361_s19  ;;  %v1093_v36 = vadd.f32 %v3029_v56, %v1075_v23 }
 0x1af   : > { %v3378_v25 = vadd.f32 %v1632_v49, %v1614_v22  ;;  %1010 = vrot.lane.b32.xlu0 %v1003_v27, %s2361_s19  ;;  %v1141_v27 = vadd.f32 %v1135_v19, %v3206_v16 }
 0x1b0   : > { %v1116_v31 = vadd.f32 %v3154_v10, %v1093_v36 }
 0x1b1   : > { %v1152_v58 = vpop.permute.xlu0 %1151  ;;  %v1317_v20 = vpop.permute.xlu1 %1316 }
 0x1b2   : > { %1012 = vrot.lane.b32.xlu1 %v1004_v5, %s2361_s19  ;;  %v1139_v14 = vadd.f32 %v3285_v32, %v1116_v31  ;;  %v1157_v44 = vsel %vm609_vm9, %v1152_v58, %v1154_v40  ;;  %s2276_s19 = sshll.u32 %s2368_s28, 4  ;;  %s2277_s19 = int_to_ptr.vmem [resolvable:$false] %s2276_s19 }
 0x1b3   : > { %v1163_v10 = vadd.f32 %v1157_v44, %v1140_v41  ;;  %p2279_p8 = scmp.lt.s32.totalorder %s3547_s17, %s2277_s19 }
 0x1b4   : > { %v1162_v52 = vadd.f32 %v1152_v58, %v1139_v14  ;;  %v1587_v14 = vmul.f32 %v2895_v15, %v3339_v51 }
 0x1b5   : > { %v1156_v18 = vpop.permute.xlu0 %1155  ;;  %v1321_v29 = vpop.permute.xlu1 %1320 }
 0x1b6   : > { %v1158_v22 = vsel %vm609_vm9, %v1154_v40, %v1156_v18  ;;  %v1304_v18 = vadd.f32 %v3303_v11, %v3222_v17 }
 0x1b7   : > { %v1164_v34 = vadd.f32 %v1158_v22, %v1141_v27 }
 0x1b8   : > { %v1327_v26 = vadd.f32 %v1317_v20, %v1304_v18 }
 0x1b9   : > { %v1319_v59 = vpop.permute.xlu0 %1318  ;;  %v3380_v2 = vpop.permute.xlu1 %1484 }
 0x1ba   : > { %v1322_v57 = vsel %vm585_vm8, %v1317_v20, %v1319_v59  ;;  %v1323_v63 = vsel %vm585_vm8, %v1319_v59, %v1321_v29  ;;  %v1631_v59 = vsel %vm510_vm13, %v3367_v48, %v3341_v46 }
 0x1bb   : > { %v1328_v47 = vadd.f32 %v1322_v57, %v3316_v24  ;;  %v1329_v11 = vadd.f32 %v1323_v63, %v3331_v53 }
 0x1bd   : > { %v3387_v37 = vpop.permute.xlu0 %1482  ;;  %v3389_v35 = vpop.permute.xlu1 %1648 }
 0x1be   : > { %v1488_v24 = vsel %vm561_vm7, %v3387_v37, %v3380_v2  ;;  %v1493_v15 = vadd.f32 %v3387_v37, %v3310_v39 }
 0x1bf   : > { %v1494_v46 = vadd.f32 %v1488_v24, %v3353_v30 }
 0x1c1   : > { %v1487_v8 = vpop.permute.xlu0 %1486  ;;  %v3394_v50 = vpop.permute.xlu1 %1652 }
 0x1c5   : > { %v3397_v62 = vpop.permute.xlu0 %1650  ;;  %v1340_v55 = vpop.permute.xlu1 %1339 }
 0x1c6   : > { %v1350_v36 = vadd.f32 %v1340_v55, %v1327_v26 }
 0x1c9   : > { %v2195_v56 = vpop.permute.xlu0 %2194  ;;  %v1344_v61 = vpop.permute.xlu1 %1343 }
 0x1ca   : > { %v2197_v28 = vunpack.i.h.bf16 %v2195_v56  ;;  %v2196_v13 = vunpack.i.l.bf16 %v2195_v56  ;;  %v1489_v56 = vsel %vm561_vm7, %v3380_v2, %v1487_v8 }
 0x1cb   : > { %v1495_v2 = vadd.f32 %v1489_v56, %v3356_v12  ;;  %v463_v56 = vstv %s1977_s7 }
 0x1cc   : > { %v1181_v32 = vsel %vm534_vm6, %v2196_v13, %v2197_v28  ;;  %v1185_v21 = vmul.f32 %v2196_v13, %v1162_v52  ;;  %v1187_v38 = vmul.f32 %v2197_v28, %v1164_v34  ;;  %v1613_v52 = vadd.f32 %v3272_v1, %v1587_v14 }
 0x1cd   : > { %v1186_v49 = vmul.f32 %v1181_v32, %v1163_v10  ;;  %v1342_v5 = vpop.permute.xlu0 %1341  ;;  %v1508_v3 = vpop.permute.xlu1 %1507  ;;  %v1589_v28 = vmul.f32 %v3114_v7, %v3339_v51  ;;  %v1654_v1 = vsel %vm534_vm6, %v3389_v35, %v3397_v62 }
 0x1ce   : > { %1191 = vrot.lane.b32.xlu0 %v1185_v21, %s2362_s24  ;;  %v1345_v4 = vsel %vm609_vm9, %v1340_v55, %v1342_v5  ;;  %v1346_v17 = vsel %vm609_vm9, %v1342_v5, %v1344_v61  ;;  %v1636_v37 = vadd.f32 %v1631_v59, %v1613_v52 }
 0x1cf   : > { %1193 = vrot.lane.b32.xlu1 %v1186_v49, %s2362_s24  ;;  %v1351_v44 = vadd.f32 %v1345_v4, %v1328_v47  ;;  %v1352_v53 = vadd.f32 %v1346_v17, %v1329_v11 }
 0x1d0   : > { %v1659_v21 = vadd.f32 %v3389_v35, %v1636_v37  ;;  %v1655_v35 = vsel %vm534_vm6, %v3397_v62, %v3394_v50 }
 0x1d1   : > { %v1506_v60 = vpop.permute.xlu0 %1505  ;;  %v3412_v58 = vpop.permute.xlu1 %1671 }
 0x1d2   : > { %1195 = vrot.lane.b32.xlu0 %v1187_v38, %s2362_s24  ;;  %v1511_v61 = vsel %vm585_vm8, %v1506_v60, %v1508_v3  ;;  %v1516_v48 = vadd.f32 %v1506_v60, %v1493_v15  ;;  %v1615_v60 = vadd.f32 %v3277_v45, %v1589_v28  ;;  %v1682_v26 = vadd.f32 %v3412_v58, %v1659_v21  ;;  %v3699_v21 = vld [vmem:[#allocation15_spill] sm:$0xff]  ;;  %s2278_s24 = scalar_lea.vmem %s2277_s19, 256 }
 0x1d3   : > { %v1517_v8 = vadd.f32 %v1511_v61, %v1494_v46  ;;  %v462_v15 = vstv %s353_s20  ;;  %v2228_v46 = vld [vmem:[#allocation2 + $0x10] sm:$0xff]  ;;  %p2280_p9 = scmp.lt.s32.totalorder %s2278_s24, %s2272_s30 }
 0x1d4   : > { %v1638_v63 = vadd.f32 %v3373_v54, %v1615_v60  ;;  %v464_v61 = vsel %vm453_vm0, %v462_v15, %v463_v56  ;;  %vm825_vm0 = vcmask 1039360   ;;  %v3712_v15 = vld [vmem:[#allocation26_spill] sm:$0xff] }
 0x1d5   : > { %v1510_v43 = vpop.permute.xlu0 %1509  ;;  %v3414_v33 = vpop.permute.xlu1 %1675  ;;  %p2281_p10 = por %p2280_p9, %p2279_p8 }
 0x1d6   : > { %v1512_v10 = vsel %vm585_vm8, %v1508_v3, %v1510_v43  ;;  %v1660_v43 = vadd.f32 %v1654_v1, %v3378_v25 }
 0x1d7   : > { %v1518_v34 = vadd.f32 %v1512_v10, %v1495_v2  ;;  %v3696_v10 = vld [vmem:[#allocation21_spill] sm:$0xff]  ;;  %p2282_p1 = pnand %p2281_p10, %p2275_p7 }
 0x1d9   : > { %v3416_v40 = vpop.permute.xlu0 %1673  ;;  %v1529_v16 = vpop.permute.xlu1 %1528 }
 0x1da   : > { %v1539_v51 = vadd.f32 %v1529_v16, %v1516_v48  ;;  %v1677_v12 = vsel %vm561_vm7, %v3412_v58, %v3416_v40  ;;  %v1678_v45 = vsel %vm561_vm7, %v3416_v40, %v3414_v33  ;;  %v465_v48 = vmul.f32 %v2228_v46, %v464_v61 }
 0x1dd   : > { %v2200_v0 = vpop.permute.xlu0 %2199  ;;  %v1533_v23 = vpop.permute.xlu1 %1532 }
 0x1de   : > { %v2202_v31 = vunpack.i.h.bf16 %v2200_v0  ;;  %v2201_v42 = vunpack.i.l.bf16 %v2200_v0  ;;  %v1683_v0 = vadd.f32 %v1677_v12, %v1660_v43 }
 0x1e0   : > { %v1370_v20 = vsel %vm1369_vm12, %v2201_v42, %v2202_v31  ;;  %v1374_v29 = vmul.f32 %v2201_v42, %v1350_v36  ;;  %v1376_v13 = vmul.f32 %v2202_v31, %v1352_v53  ;;  %v1661_v36 = vadd.f32 %v1655_v35, %v1638_v63 }
 0x1e1   : > { %v1375_v55 = vmul.f32 %v1370_v20, %v1351_v44  ;;  %v1531_v41 = vpop.permute.xlu0 %1530  ;;  %v1697_v19 = vpop.permute.xlu1 %1696 }
 0x1e2   : > { %1380 = vrot.lane.b32.xlu1 %v1374_v29, %s2363_s25  ;;  %v1534_v39 = vsel %vm609_vm9, %v1529_v16, %v1531_v41  ;;  %v1535_v5 = vsel %vm609_vm9, %v1531_v41, %v1533_v23  ;;  %v1684_v17 = vadd.f32 %v1678_v45, %v1661_v36  ;;  %v3706_v36 = vld [vmem:[#allocation17_spill] sm:$0xff] }
 0x1e3   : > { %1382 = vrot.lane.b32.xlu0 %v1375_v55, %s2363_s25  ;;  %v1540_v49 = vadd.f32 %v1534_v39, %v1517_v8  ;;  %v1541_v4 = vadd.f32 %v1535_v5, %v1518_v34  ;;  %v3695_v39 = vld [vmem:[#allocation13_spill] sm:$0xff]  ;;  %v467_v8 = vmul.f32 %v3114_v7, %v464_v61  ;;  %v3700_v34 = vld [vmem:[#allocation16_spill] sm:$0xff] }
 0x1e5   : > { %v1695_v22 = vpop.permute.xlu0 %1694  ;;  %v2205_v27 = vpop.permute.xlu1 %2204  ;;  %v494_v7 = vadd.f32 %v3700_v34, %v467_v8 }
 0x1e6   : > { %1384 = vrot.lane.b32.xlu1 %v1376_v13, %s2363_s25  ;;  %v2207_v30 = vunpack.i.h.bf16 %v2205_v27  ;;  %v2206_v32 = vunpack.i.l.bf16 %v2205_v27  ;;  %v1700_v47 = vsel %vm585_vm8, %v1695_v22, %v1697_v19  ;;  %v1705_v25 = vadd.f32 %v1695_v22, %v1682_v26  ;;  %v3694_v13 = vld [vmem:[#allocation19_spill] sm:$0xff]  ;;  %v3697_v22 = vld [vmem:[#allocation12_spill] sm:$0xff]  ;;  %v3703_v26 = vld [vmem:[#allocation14_spill] sm:$0xff] }
 0x1e7   : > { %v1706_v31 = vadd.f32 %v1700_v47, %v1683_v0  ;;  %v487_v37 = vsel %vm486_vm1, %v3695_v39, %v3694_v13  ;;  %v511_v27 = vsel %vm510_vm13, %v3697_v22, %v3696_v10  ;;  %v488_v12 = vsel %vm486_vm1, %v3694_v13, %v3700_v34 }
 0x1e8   : > { %v1559_v3 = vsel %vm1558_vm14, %v2206_v32, %v2207_v30  ;;  %v1563_v38 = vmul.f32 %v2206_v32, %v1539_v51  ;;  %v1565_v23 = vmul.f32 %v2207_v30, %v1541_v4  ;;  %v492_v1 = vadd.f32 %v487_v37, %v465_v48  ;;  %v3698_v32 = vld [vmem:[#allocation20_spill] sm:$0xff]  ;;  %v3704_v4 = vld [vmem:[#allocation25_spill] sm:$0xff] }
 0x1e9   : > { %v1699_v16 = vpop.permute.xlu0 %1698  ;;  %v1564_v18 = vmul.f32 %v1559_v3, %v1540_v49  ;;  %v1720_v57 = vpop.permute.xlu1 %1719  ;;  %v466_v30 = vmul.f32 %v3136_v6, %v464_v61  ;;  %v535_v49 = vsel %vm534_vm6, %v3699_v21, %v3698_v32  ;;  %v563_v47 = vsel %vm561_vm7, %v3704_v4, %v3703_v26 }
 0x1ea   : > { %1569 = vrot.lane.b32.xlu0 %v1563_v38, %s2364_s23  ;;  %v1701_v50 = vsel %vm585_vm8, %v1697_v19, %v1699_v16  ;;  %v516_v3 = vadd.f32 %v511_v27, %v492_v1  ;;  %v3701_v38 = vld [vmem:[#allocation18_spill] sm:$0xff]  ;;  %vm1014_vm1 = vcmask 1031168  }
 0x1eb   : > { %1571 = vrot.lane.b32.xlu1 %v1564_v18, %s2364_s23  ;;  %v1707_v33 = vadd.f32 %v1701_v50, %v1684_v17  ;;  %v512_v60 = vsel %vm510_vm13, %v3696_v10, %v3701_v38  ;;  %v493_v18 = vadd.f32 %v488_v12, %v466_v30  ;;  %v518_v6 = vadd.f32 %v3701_v38, %v494_v7  ;;  %v3709_v17 = vld [vmem:[#allocation28_spill] sm:$0xff] }
 0x1ec   : > { %v540_v43 = vadd.f32 %v535_v49, %v516_v3  ;;  %vm634_vm13 = vcmask 629760  }
 0x1ed   : > { %v1718_v62 = vpop.permute.xlu0 %1717  ;;  %v2210_v58 = vpop.permute.xlu1 %2209  ;;  %v517_v63 = vadd.f32 %v512_v60, %v493_v18 }
 0x1ee   : > { %v1728_v42 = vadd.f32 %v1718_v62, %v1705_v25  ;;  %v1723_v14 = vsel %vm609_vm9, %v1718_v62, %v1720_v57  ;;  %v2212_v44 = vunpack.i.h.bf16 %v2210_v58  ;;  %v2211_v54 = vunpack.i.l.bf16 %v2210_v58  ;;  %1573 = vrot.lane.b32.xlu0 %v1565_v23, %s2364_s23  ;;  %v3705_v25 = vld [vmem:[#allocation22_spill] sm:$0xff] }
 0x1ef   : > { %v1729_v11 = vadd.f32 %v1723_v14, %v1706_v31  ;;  %v567_v23 = vadd.f32 %v3705_v25, %v540_v43  ;;  %v3707_v31 = vld [vmem:[#allocation24_spill] sm:$0xff] }
 0x1f0   : > { %v1748_v24 = vsel %vm1747_vm15, %v2211_v54, %v2212_v44  ;;  %v1752_v20 = vmul.f32 %v2211_v54, %v1728_v42  ;;  %v587_v50 = vsel %vm585_vm8, %v3707_v31, %v3706_v36  ;;  %v562_v42 = vsel %vm561_vm7, %v3705_v25, %v3704_v4 }
 0x1f1   : > { %v1722_v40 = vpop.permute.xlu0 %1721  ;;  %v1753_v29 = vmul.f32 %v1748_v24, %v1729_v11  ;;  %v3710_v11 = vld [vmem:[#allocation29_spill] sm:$0xff] }
 0x1f2   : > { %v1724_v59 = vsel %vm609_vm9, %v1720_v57, %v1722_v40  ;;  %1758 = vrot.lane.b32.xlu1 %v1752_v20, %s2365_s4  ;;  %v3702_v57 = vld [vmem:[#allocation23_spill] sm:$0xff]  ;;  %v611_v24 = vsel %vm609_vm9, %v3710_v11, %v3709_v17  ;;  %v3711_v20 = vld [vmem:[#allocation30_spill] sm:$0xff]  ;;  %v610_v61 = vsel %vm609_vm9, %v3712_v15, %v3710_v11 }
 0x1f3   : > { %v1730_v55 = vadd.f32 %v1724_v59, %v1707_v33  ;;  %1760 = vrot.lane.b32.xlu0 %v1753_v29, %s2365_s4  ;;  %v536_v35 = vsel %vm534_vm6, %v3698_v32, %v3702_v57  ;;  %v542_v0 = vadd.f32 %v3702_v57, %v518_v6  ;;  %v2181_v33 = vunpack.i.l.bf16 %v3711_v20 }
 0x1f4   : > { %v541_v58 = vadd.f32 %v536_v35, %v517_v63  ;;  %v2182_v59 = vunpack.i.h.bf16 %v3711_v20  ;;  %vm1848_vm6 = vcmask 416768  }
 0x1f5   : > { %v1754_v41 = vmul.f32 %v2212_v44, %v1730_v55  ;;  %v569_v14 = vadd.f32 %v563_v47, %v542_v0  ;;  %v3708_v44 = vld [vmem:[#allocation27_spill] sm:$0xff] }
 0x1f6   : > { %v591_v54 = vadd.f32 %v3708_v44, %v567_v23  ;;  %v586_v29 = vsel %vm585_vm8, %v3708_v44, %v3707_v31  ;;  %v635_v8 = vsel %vm634_vm13, %v2181_v33, %v2182_v59 }
 0x1f7   : > { %1762 = vrot.lane.b32.xlu1 %v1754_v41, %s2365_s4  ;;  %v593_v40 = vadd.f32 %v587_v50, %v569_v14  ;;  %v568_v41 = vadd.f32 %v562_v42, %v541_v58 }
 0x1f8   : > { %v615_v56 = vadd.f32 %v3712_v15, %v591_v54 }
 0x1f9   : > { %v617_v46 = vadd.f32 %v611_v24, %v593_v40  ;;  %v592_v13 = vadd.f32 %v586_v29, %v568_v41 }
 0x1fa   : > { %v639_v39 = vmul.f32 %v2181_v33, %v615_v56 }
 0x1fb   : > { %v616_v27 = vadd.f32 %v610_v61, %v592_v13  ;;  %v641_v30 = vmul.f32 %v2182_v59, %v617_v46  ;;  %v2366_v61 = vmov 1966171168  }
 0x1fc   : > { %v1805_v46 = vunpack.c.l.s4 %v2366_v61 }
 0x1fd   : > { %v640_v49 = vmul.f32 %v635_v8, %v616_v27 }
 0x200   : > { %v820_v19 = vpop.permute.xlu0 %819 }
 0x201   : > { %v822_v53 = vpop.permute.xlu1 %821 }
 0x202   : > { %v826_v48 = vsel %vm825_vm0, %v820_v19, %v822_v53 }
 0x203   : > { %v831_v1 = vadd.f32 %v826_v48, %v639_v39  ;;  %v1806_v48 = vunpack.c.0.s8 %v1805_v46 }
 0x204   : > { %v3471_v52 = vpop.permute.xlu0 %823 }
 0x205   : > { %v827_v32 = vsel %vm825_vm0, %v822_v53, %v3471_v52  ;;  %v833_v12 = vadd.f32 %v3471_v52, %v641_v30 }
 0x206   : > { %v832_v38 = vadd.f32 %v827_v32, %v640_v49 }
 0x220   : > { %v1009_v28 = vpop.permute.xlu1 %1008 }
 0x221   : > { %v1011_v2 = vpop.permute.xlu0 %1010 }
 0x222   : > { %v1015_v10 = vsel %vm1014_vm1, %v1009_v28, %v1011_v2 }
 0x223   : > { %v1020_v34 = vadd.f32 %v1015_v10, %v831_v1 }
 0x224   : > { %v1013_v51 = vpop.permute.xlu1 %1012 }
 0x225   : > { %v1016_v3 = vsel %vm1014_vm1, %v1011_v2, %v1013_v51  ;;  %v1022_v43 = vadd.f32 %v1013_v51, %v833_v12  ;;  %v3713_v12 = vlaneseq }
 0x226   : > { %v1021_v6 = vadd.f32 %v1016_v3, %v832_v38 }
 0x227   : > { %vm3536_vm7 = vcmp.lt.s32.totalorder %v3713_v12, 256 }
 0x240   : > { %v1192_v5 = vpop.permute.xlu0 %1191 }
 0x241   : > { %v1194_v16 = vpop.permute.xlu1 %1193 }
 0x242   : > { %v1198_v21 = vsel %vm1197_vm2, %v1192_v5, %v1194_v16 }
 0x243   : > { %v1203_v60 = vadd.f32 %v1198_v21, %v1020_v34 }
 0x244   : > { %v1196_v45 = vpop.permute.xlu0 %1195 }
 0x245   : > { %v1199_v18 = vsel %vm1197_vm2, %v1194_v16, %v1196_v45  ;;  %v1205_v57 = vadd.f32 %v1196_v45, %v1022_v43 }
 0x246   : > { %v1204_v52 = vadd.f32 %v1199_v18, %v1021_v6 }
 0x254   : > { %v1381_v62 = vpop.permute.xlu1 %1380 }
 0x255   : > { %v1383_v55 = vpop.permute.xlu0 %1382 }
 0x256   : > { %v1387_v28 = vsel %vm1386_vm3, %v1381_v62, %v1383_v55 }
 0x257   : > { %v1392_v5 = vadd.f32 %v1387_v28, %v1203_v60 }
 0x258   : > { %v1385_v37 = vpop.permute.xlu1 %1384 }
 0x259   : > { %v1388_v35 = vsel %vm1386_vm3, %v1383_v55, %v1385_v37  ;;  %v1394_v47 = vadd.f32 %v1385_v37, %v1205_v57  ;;  %v1809_v37 = vsub.s32 %v1806_v48, %v2532_v9 }
 0x25a   : > { %v1393_v51 = vadd.f32 %v1388_v35, %v1204_v52 }
 0x25c   : > { %v1570_v22 = vpop.permute.xlu0 %1569 }
 0x25d   : > { %v1572_v19 = vpop.permute.xlu1 %1571 }
 0x25e   : > { %v1576_v53 = vsel %vm1575_vm4, %v1570_v22, %v1572_v19 }
 0x25f   : > { %v1581_v4 = vadd.f32 %v1576_v53, %v1392_v5 }
 0x260   : > { %v1574_v7 = vpop.permute.xlu0 %1573 }
 0x261   : > { %v1577_v63 = vsel %vm1575_vm4, %v1572_v19, %v1574_v7  ;;  %v1583_v16 = vadd.f32 %v1574_v7, %v1394_v47 }
 0x262   : > { %v1582_v23 = vadd.f32 %v1577_v63, %v1393_v51 }
 0x264   : > { %v1759_v26 = vpop.permute.xlu1 %1758 }
 0x265   : > { %v1761_v2 = vpop.permute.xlu0 %1760 }
 0x266   : > { %v1765_v0 = vsel %vm1764_vm5, %v1759_v26, %v1761_v2 }
 0x267   : > { %v1770_v25 = vadd.f32 %v1765_v0, %v1581_v4 }
 0x269   : > { %v1776_v36 = vrot.slane %v1770_v25, 4  ;;  %v1763_v31 = vpop.permute.xlu1 %1762 }
 0x26a   : > { %v1766_v50 = vsel %vm1764_vm5, %v1761_v2, %v1763_v31  ;;  %v1772_v45 = vadd.f32 %v1763_v31, %v1583_v16 }
 0x26b   : > { %v1782_v62 = vadd.f32 %v1776_v36, %v1770_v25  ;;  %v1771_v58 = vadd.f32 %v1766_v50, %v1582_v23 }
 0x26c   : > { %v1778_v42 = vrot.slane %v1772_v45, 4 }
 0x26d   : > { %v1785_v14 = vsub.f32 0.0, %v1782_v62  ;;  %v1777_v44 = vrot.slane %v1771_v58, 4 }
 0x26e   : > { %v1784_v54 = vadd.f32 %v1778_v42, %v1772_v45 }
 0x26f   : > { %v1788_v17 = vmul.f32 1.442695, %v1785_v14  ;;  %v1783_v11 = vadd.f32 %v1777_v44, %v1771_v58 }
 0x270   : > { %v1787_v24 = vsub.f32 0.0, %v1784_v54 }
 0x271   : > { %2213 = vpow2.f32 %v1788_v17  ;;  %v1786_v20 = vsub.f32 0.0, %v1783_v11 }
 0x272   : > { %v1792_v33 = vmul.f32 1.442695, %v1787_v24 }
 0x273   : > { %v1790_v40 = vmul.f32 1.442695, %v1786_v20 }
 0x274   : > { %2215 = vpow2.f32 %v1792_v33 }
 0x275   : > { %2217 = vpow2.f32 %v1790_v40 }
 0x27e   : > { %v2214_v29 = vpop.eup %2213 }
 0x27f   : > { %v1794_v59 = vadd.f32 1.0, %v2214_v29 }
 0x281   : > { %v2216_v55 = vpop.eup %2215  ;;  %2219 = vrcp.f32 %v1794_v59 }
 0x282   : > { %v2218_v41 = vpop.eup %2217  ;;  %v1796_v15 = vadd.f32 1.0, %v2216_v55 }
 0x283   : > { %v1795_v56 = vadd.f32 1.0, %v2218_v41 }
 0x284   : > { %2221 = vrcp.f32 %v1796_v15 }
 0x285   : > { %2223 = vrcp.f32 %v1795_v56 }
 0x28e   : > { %v2220_v13 = vpop.eup %2219 }
 0x291   : > { %v2222_v39 = vpop.eup %2221 }
 0x292   : > { %v2224_v8 = vpop.eup %2223  ;;  %v1817_v27 = vrot.slane %v2222_v39, %v1809_v37 }
 0x293   : > { %v1803_v10 = vcombine.low %v2220_v13, %v2224_v8 }
 0x295   : > { %v1810_v22 = vrot.slane %v1803_v10, %v1809_v37 }
 0x297   : > { %v1819_v1 = vcombine.high %v1810_v22, %v1817_v27  ;;  %v1818_v30 = vcombine.low %v1810_v22, %v1817_v27 }
 0x299   : > { %v1833_v32 = vrot.slane %v1819_v1, %v1809_v37  ;;  %v1826_v21 = vrot.slane %v1818_v30, %v1809_v37 }
 0x29b   : > { %1838 = vrot.lane.b32.xlu1 %v1833_v32, %s2367_s6  ;;  %1836 = vrot.lane.b32.xlu0 %v1826_v21, %s2367_s6  ;;  %v1835_v49 = vcombine.high %v1833_v32, %v1833_v32  ;;  %v1834_v34 = vcombine.high %v1826_v21, %v1826_v21 }
 0x29f   : > { %1842 = vrot.lane.b32.xlu1 %v1835_v49, %s2367_s6  ;;  %1840 = vrot.lane.b32.xlu0 %v1834_v34, %s2367_s6 }
 0x30d   : > { %v1839_v9 = vpop.permute.xlu1 %1838  ;;  %v1837_v19 = vpop.permute.xlu0 %1836 }
 0x30e   : > { %v1845_v28 = vrot.slane %v1839_v9, 1  ;;  %v1844_v7 = vrot.slane %v1837_v19, 1 }
 0x310   : > { %v1850_v38 = vsel %vm1848_vm6, %v1839_v9, %v1845_v28  ;;  %v1849_v60 = vsel %vm1848_vm6, %v1837_v19, %v1844_v7 }
 0x311   : > { %1862 = vst.msk [vmem:[%s176_s16 + $0x2] sm:$0x3] %vm3536_vm7, %v1850_v38  ;;  %1861 = vst.msk [vmem:[%s176_s16] sm:$0x3] %vm3536_vm7, %v1849_v60  ;;  %v1843_v43 = vpop.permute.xlu1 %1842  ;;  %v1841_v18 = vpop.permute.xlu0 %1840 }
 0x312   : > { %v1847_v53 = vrot.slane %v1843_v43, 1  ;;  %v1846_v6 = vrot.slane %v1841_v18, 1 }
 0x314   : > { %v1852_v5 = vsel %vm1848_vm6, %v1843_v43, %v1847_v53  ;;  %v1851_v57 = vsel %vm1848_vm6, %v1841_v18, %v1846_v6 }
 0x315   : > { %1864 = vst.msk [vmem:[%s176_s16 + $0x6] sm:$0x3] %vm3536_vm7, %v1852_v5  ;;  %1863 = vst.msk [vmem:[%s176_s16 + $0x4] sm:$0x3] %vm3536_vm7, %v1851_v57 }
 0x316   : > { %2285 = shalt.err (!%p2282_p1)
}
 0x317   : > { %s2286_s25 = scalar_lea.hbm %s3552_s13, 128  ;;  %s2290_s20 = scalar_lea.hbm %s3605_s2, 256 }
 0x318   : > { %p2287_p4 = scmp.ne.s32.totalorder %s3552_s13, %s2286_s25  ;;  %p2291_p6 = scmp.lt.s32.totalorder %s3552_s13, %s3605_s2 }
 0x319   : > { %p2292_p13 = scmp.lt.s32.totalorder %s2290_s20, %s2286_s25 }
 0x31a   : > { %p2288_p11 = pnand %p2287_p4, %p3716_p0 }
 0x31b   : > { %p2293_p3 = por %p2292_p13, %p2291_p6 }
 0x31c   : > { %p2289_p5 = pneg %p2288_p11 }
 0x31e   : > { %p2294_p12 = pnand %p2293_p3, %p2289_p5 }
 0x320   : > { %2297 = shalt.err (!%p2294_p12)
}
 0x321   : > { %s2369_s3 = smov 2  }
 0x322   : > { %2102 = dma.vmem_to_hbm [thread:$0]  (%p3716_p0), %s3547_s17, 128, %s3552_s13, %s1866_s5, %s2352_s29, %s2352_s29, %s2369_s3  }
 0x323 PF: > { %s1895_s16 = sand.u32 1, %s2328_s9   ;;  %p3717_p2 = scmp.ne.s32.totalorder %s3637_s22, 0 }
 0x324   : > { %p3718_p7 = scmp.ge.s32.totalorder %s2340_s12, 2  ;;  %s1896_s8 = scalar_lea.sflag [#allocation5], %s1895_s16 }
 0x326   : > { %p2113_p8 = pnand %p3718_p7, %p3717_p2 }
 0x328   : > { %p2114_p9 = pneg %p2113_p8 }
 0x32a   : > { %2323 = dma.done.wait (%p2114_p9), %s1896_s8, 128  }
 0x32b   : > { %2325 = vsyncadd (%p2114_p9), %s1896_s8, 4294967168  ;;  %p16_p10 = scmp.ge.s32.totalorder %s2410_s15, 4   ;;  %s3719_s9 = smov %s2332_s10 }
 0x32c   : > { %s3720_s10 = smov %s2336_s11  ;;  %s3721_s11 = smov %s2422_s18 }
 0x32d   : > { %s3722_s12 = smov %s2410_s15  ;;  %18 = sbr.rel (!%p16_p10) target bundleno = 6 (0x6), region = 78 }
 0x332   :  { %1901 = vsyncpa [#allocation4], 1 }
 0x333   :  { %1903 = vsyncpa [#allocation4 + $0x1], 1 }
 0x334   :  { %1904 = vsyncpa [#allocation5], 1 }
 0x335   :  { %1906 = vsyncpa [#allocation5 + $0x1], 1 }
 0x336   :  { %1907 = vsyncpa [#allocation6], 1 }
 0x337   :  { %1909 = vsyncpa [#allocation6 + $0x1], 1 }

</bundles_post_ra>
